<compile_context>
chip_gen: v7x
topology: tpu7x:2x2x1
jax: 0.10.0
libtpu: 0.0.40
codegen_flags: <defaults>
</compile_context>

<pallas_src>
import jax
import jax.numpy as jnp
import numpy as np
from jax.experimental import pallas as pl
from jax.experimental.pallas import tpu as pltpu

EPS = 1e-5
LANES = 128
SUBLANES = 8


def _round_up(x, m):
    return ((x + m - 1) // m) * m


def _make_kernel(N, C, H, W, Cp, L2, ALIGN, LBUF):
    """Build the fused residual-block kernel for static shapes."""
    Wp = W + 2
    Lp = (H + 2) * Wp
    count = float(N * H * W)

    def kernel(x_ref, mask_ref, w1_ref, g1_ref, b1_ref,
               w2_ref, g2_ref, b2_ref, o_ref, xpf_ref, p2_ref):
        # x_ref   : (N, C, H*W)  NCHW input (trailing dims flattened; no wrapper repack)
        # mask_ref: (1, L2)      1.0 on valid conv-center positions
        # w*_ref  : (9, Cp, Cp)  conv taps, t = dy*3+dx, [t, c_out, c_in]
        # g*/b*   : (Cp, 1)      BN affine params (zero-padded channels)
        # o_ref   : (N, C, H*W)  output, NCHW with trailing dims flattened
        # xpf_ref : (Cp, LBUF)   zero-padded channel-major flat input (conv1 + identity)
        # p2_ref  : (Cp, LBUF)   re-padded hidden activation / output staging
        mask = mask_ref[...]

        def rowpos(n, r):
            # flat-buffer offset of the first real pixel of (image n, row r)
            return ALIGN + n * Lp + r * Wp

        # ---- in-kernel input repack: NCHW -> padded, channel-major, flat ----
        xpf_ref[...] = jnp.zeros((Cp, LBUF), jnp.float32)
        for n in range(N):
            for r in range(H):
                p = rowpos(n, r)
                xpf_ref[0:C, p:p + W] = x_ref[n, :, r * W:(r + 1) * W]

        def conv3x3(src_ref, w_ref):
            # 9 accumulated small matmuls -- no im2col scratch / stores.
            acc = None
            for dy in range(3):
                for dx in range(3):
                    t = dy * 3 + dx
                    off = ALIGN + (dy - 1) * Wp + (dx - 1)
                    c = jnp.dot(w_ref[t], src_ref[:, off:off + L2],
                                preferred_element_type=jnp.float32)
                    acc = c if acc is None else acc + c
            return acc                                          # (Cp, L2)

        def batchnorm(h, g_ref, b_ref):
            # training-mode BN; one-pass stats over valid (N,H,W) positions.
            hm = h * mask
            s = jnp.sum(hm, axis=1, keepdims=True)              # (Cp, 1)
            ss = jnp.sum(hm * h, axis=1, keepdims=True)         # (Cp, 1)
            mean = s / count
            var = ss / count - mean * mean
            scale = g_ref[...] * jax.lax.rsqrt(var + EPS)
            shift = b_ref[...] - mean * scale
            return h * scale + shift

        # ---- conv1 -> bn1 -> relu ----
        h1 = jnp.maximum(batchnorm(conv3x3(xpf_ref, w1_ref), g1_ref, b1_ref), 0.0)

        # ---- re-pad hidden activation for conv2 ----
        # lane-dense 128-wide border slabs, then lane-aligned masked interior.
        p2_ref[:, 0:ALIGN] = jnp.zeros((Cp, ALIGN), jnp.float32)
        p2_ref[:, ALIGN + L2:LBUF] = jnp.zeros((Cp, LBUF - ALIGN - L2), jnp.float32)
        p2_ref[:, ALIGN:ALIGN + L2] = h1 * mask

        # ---- conv2 -> bn2 -> +identity -> relu ----
        h2 = batchnorm(conv3x3(p2_ref, w2_ref), g2_ref, b2_ref)
        identity = xpf_ref[:, ALIGN:ALIGN + L2]      # x, resident & lane-aligned
        result = jnp.maximum(h2 + identity, 0.0)     # (Cp, L2)

        # ---- in-kernel output repack: flat -> NCHW ----
        # stage in p2's (now dead) interior, then emit per-row NCHW slices.
        p2_ref[:, ALIGN:ALIGN + L2] = result
        for n in range(N):
            for r in range(H):
                p = rowpos(n, r)
                o_ref[n, :, r * W:(r + 1) * W] = p2_ref[0:C, p:p + W]

    return kernel


@jax.jit
def residual_block(x_nchw, w1_oihw, g1, b1, w2_oihw, g2, b2):
    """PyTorch-facing wrapper: NCHW in / NCHW out (f32, training-mode BN)."""
    N, C, H, W = x_nchw.shape
    Cp = _round_up(max(C, SUBLANES), SUBLANES)            # sublane-padded channels
    Hp, Wp = H + 2, W + 2
    Lp = Hp * Wp
    L2_raw = N * Lp - 2 * Wp - 2                           # tap-aligned domain length
    L2 = _round_up(L2_raw, LANES)                          # lane-dense domain
    ALIGN = _round_up(Wp + 1, LANES)                       # 128-aligned interior start
    LBUF = ALIGN + L2 + ALIGN                              # padded flat buffer length

    # static validity mask for the lane-dense conv-center domain (baked-in constant)
    i = np.arange(L2)
    j = i + Wp + 1                                         # global padded position
    m = j % Lp
    row, col = m // Wp, m % Wp
    valid = ((i < L2_raw) & (j < N * Lp)
             & (row >= 1) & (row <= H) & (col >= 1) & (col <= W))
    mask = jnp.asarray(valid.astype(np.float32)).reshape(1, L2)

    def pack_w(w_oihw):
        # OIHW -> (9, Cp, Cp); tap order t = dy*3 + dx; zero-padded channels
        w = jnp.transpose(w_oihw, (2, 3, 0, 1)).reshape(9, C, C)
        return jnp.pad(w, ((0, 0), (0, Cp - C), (0, Cp - C)))

    def pack_p(p):
        return jnp.pad(p, (0, Cp - C)).reshape(Cp, 1)

    x_flat = x_nchw.reshape(N, C, H * W)                   # metadata-only reshape

    vmem = pl.BlockSpec(memory_space=pltpu.MemorySpace.VMEM)
    out = pl.pallas_call(
        _make_kernel(N, C, H, W, Cp, L2, ALIGN, LBUF),
        out_shape=jax.ShapeDtypeStruct((N, C, H * W), jnp.float32),
        in_specs=[vmem] * 8,
        out_specs=vmem,
        scratch_shapes=[
            pltpu.VMEM((Cp, LBUF), jnp.float32),   # padded input (conv1 + identity)
            pltpu.VMEM((Cp, LBUF), jnp.float32),   # padded hidden / output staging
        ],
        compiler_params=pltpu.CompilerParams(vmem_limit_bytes=32 * 1024 * 1024),
    )(x_flat, mask, pack_w(w1_oihw), pack_p(g1), pack_p(b1),
      pack_w(w2_oihw), pack_p(g2), pack_p(b2))

    return out.reshape(N, C, H, W)                         # metadata-only reshape


def _reference(x_nchw, w1_oihw, g1, b1, w2_oihw, g2, b2):
    """Pure-JAX reference mirroring the PyTorch forward (training-mode BN)."""
    def conv(x, w):
        return jax.lax.conv_general_dilated(
            x, w, window_strides=(1, 1), padding='SAME',
            dimension_numbers=('NCHW', 'OIHW', 'NCHW'))

    def bn(h, gamma, beta):
        mean = jnp.mean(h, axis=(0, 2, 3), keepdims=True)
        var = jnp.mean((h - mean) ** 2, axis=(0, 2, 3), keepdims=True)
        return ((h - mean) * jax.lax.rsqrt(var + EPS)
                * gamma.reshape(1, -1, 1, 1) + beta.reshape(1, -1, 1, 1))

    h = jnp.maximum(bn(conv(x_nchw, w1_oihw), g1, b1), 0.0)
    h = bn(conv(h, w2_oihw), g2, b2)
    return jnp.maximum(h + x_nchw, 0.0)


if __name__ == "__main__":
    key = jax.random.PRNGKey(0)
    k_x, k_w1, k_w2 = jax.random.split(key, 3)

    N, C, H, W = 2, 4, 16, 16   # in_channels == out_channels == 4, stride 1
    x = jax.random.normal(k_x, (N, C, H, W), jnp.float32)

    # deterministic parameters (PyTorch shapes: conv OIHW, BN per-channel)
    w1 = jax.random.normal(k_w1, (C, C, 3, 3), jnp.float32) * 0.1
    w2 = jax.random.normal(k_w2, (C, C, 3, 3), jnp.float32) * 0.1
    g1 = jnp.ones((C,), jnp.float32)
    b1 = jnp.zeros((C,), jnp.float32)
    g2 = jnp.ones((C,), jnp.float32)
    b2 = jnp.zeros((C,), jnp.float32)

    out = jax.block_until_ready(residual_block(x, w1, g1, b1, w2, g2, b2))
    ref = jax.block_until_ready(_reference(x, w1, g1, b1, w2, g2, b2))

    assert out.shape == (N, C, H, W)
    np.testing.assert_allclose(np.asarray(out), np.asarray(ref),
                               rtol=1e-4, atol=1e-4)
    print("KERNEL_OK")
</pallas_src>

<mosaic_0001>
module attributes {stable_mosaic.version = 11 : i64} {
  func.func @kernel(%arg0: memref<2x4x256xf32, #tpu.memory_space<vmem>>, %arg1: memref<1x640xf32, #tpu.memory_space<vmem>>, %arg2: memref<9x8x8xf32, #tpu.memory_space<vmem>>, %arg3: memref<8x1xf32, #tpu.memory_space<vmem>>, %arg4: memref<8x1xf32, #tpu.memory_space<vmem>>, %arg5: memref<9x8x8xf32, #tpu.memory_space<vmem>>, %arg6: memref<8x1xf32, #tpu.memory_space<vmem>>, %arg7: memref<8x1xf32, #tpu.memory_space<vmem>>, %arg8: memref<2x4x256xf32, #tpu.memory_space<vmem>>, %arg9: memref<8x896xf32, #tpu.memory_space<vmem>>, %arg10: memref<8x896xf32, #tpu.memory_space<vmem>>) attributes {dimension_semantics = [], scalar_prefetch = 0 : i64, scratch_operands = 2 : i64, tpu.core_type = #tpu.core_type<tc>} {
    %c0 = arith.constant 0 : index
    %c0_0 = arith.constant 0 : index
    %0 = vector.load %arg1[%c0, %c0_0] : memref<1x640xf32, #tpu.memory_space<vmem>>, vector<1x640xf32>
    %cst = arith.constant 0.000000e+00 : f32
    %1 = vector.broadcast %cst : f32 to vector<8x896xf32>
    %c0_1 = arith.constant 0 : index
    %c0_2 = arith.constant 0 : index
    %2 = vector.load %arg9[%c0_1, %c0_2] : memref<8x896xf32, #tpu.memory_space<vmem>>, vector<8x896xf32>
    tpu.vector_store %arg9[%c0_1, %c0_2], %1 {strides = array<i32>} : memref<8x896xf32, #tpu.memory_space<vmem>>, vector<8x896xf32>,
    %c0_3 = arith.constant 0 : index
    %c0_4 = arith.constant 0 : index
    %c0_5 = arith.constant 0 : index
    %3 = vector.load %arg0[%c0_3, %c0_4, %c0_5] : memref<2x4x256xf32, #tpu.memory_space<vmem>>, vector<1x4x16xf32>
    %4 = vector.shape_cast %3 : vector<1x4x16xf32> to vector<4x16xf32>
    %c0_6 = arith.constant 0 : index
    %c128 = arith.constant 128 : index
    %5 = vector.load %arg9[%c0_6, %c128] : memref<8x896xf32, #tpu.memory_space<vmem>>, vector<4x16xf32>
    tpu.vector_store %arg9[%c0_6, %c128], %4 {strides = array<i32>} : memref<8x896xf32, #tpu.memory_space<vmem>>, vector<4x16xf32>,
    %c0_7 = arith.constant 0 : index
    %c0_8 = arith.constant 0 : index
    %c16 = arith.constant 16 : index
    %6 = vector.load %arg0[%c0_7, %c0_8, %c16] : memref<2x4x256xf32, #tpu.memory_space<vmem>>, vector<1x4x16xf32>
    %7 = vector.shape_cast %6 : vector<1x4x16xf32> to vector<4x16xf32>
    %c0_9 = arith.constant 0 : index
    %c146 = arith.constant 146 : index
    %8 = vector.load %arg9[%c0_9, %c146] : memref<8x896xf32, #tpu.memory_space<vmem>>, vector<4x16xf32>
    tpu.vector_store %arg9[%c0_9, %c146], %7 {strides = array<i32>} : memref<8x896xf32, #tpu.memory_space<vmem>>, vector<4x16xf32>,
    %c0_10 = arith.constant 0 : index
    %c0_11 = arith.constant 0 : index
    %c32 = arith.constant 32 : index
    %9 = vector.load %arg0[%c0_10, %c0_11, %c32] : memref<2x4x256xf32, #tpu.memory_space<vmem>>, vector<1x4x16xf32>
    %10 = vector.shape_cast %9 : vector<1x4x16xf32> to vector<4x16xf32>
    %c0_12 = arith.constant 0 : index
    %c164 = arith.constant 164 : index
    %11 = vector.load %arg9[%c0_12, %c164] : memref<8x896xf32, #tpu.memory_space<vmem>>, vector<4x16xf32>
    tpu.vector_store %arg9[%c0_12, %c164], %10 {strides = array<i32>} : memref<8x896xf32, #tpu.memory_space<vmem>>, vector<4x16xf32>,
    %c0_13 = arith.constant 0 : index
    %c0_14 = arith.constant 0 : index
    %c48 = arith.constant 48 : index
    %12 = vector.load %arg0[%c0_13, %c0_14, %c48] : memref<2x4x256xf32, #tpu.memory_space<vmem>>, vector<1x4x16xf32>
    %13 = vector.shape_cast %12 : vector<1x4x16xf32> to vector<4x16xf32>
    %c0_15 = arith.constant 0 : index
    %c182 = arith.constant 182 : index
    %14 = vector.load %arg9[%c0_15, %c182] : memref<8x896xf32, #tpu.memory_space<vmem>>, vector<4x16xf32>
    tpu.vector_store %arg9[%c0_15, %c182], %13 {strides = array<i32>} : memref<8x896xf32, #tpu.memory_space<vmem>>, vector<4x16xf32>,
    %c0_16 = arith.constant 0 : index
    %c0_17 = arith.constant 0 : index
    %c64 = arith.constant 64 : index
    %15 = vector.load %arg0[%c0_16, %c0_17, %c64] : memref<2x4x256xf32, #tpu.memory_space<vmem>>, vector<1x4x16xf32>
    %16 = vector.shape_cast %15 : vector<1x4x16xf32> to vector<4x16xf32>
    %c0_18 = arith.constant 0 : index
    %c200 = arith.constant 200 : index
    %17 = vector.load %arg9[%c0_18, %c200] : memref<8x896xf32, #tpu.memory_space<vmem>>, vector<4x16xf32>
    tpu.vector_store %arg9[%c0_18, %c200], %16 {strides = array<i32>} : memref<8x896xf32, #tpu.memory_space<vmem>>, vector<4x16xf32>,
    %c0_19 = arith.constant 0 : index
    %c0_20 = arith.constant 0 : index
    %c80 = arith.constant 80 : index
    %18 = vector.load %arg0[%c0_19, %c0_20, %c80] : memref<2x4x256xf32, #tpu.memory_space<vmem>>, vector<1x4x16xf32>
    %19 = vector.shape_cast %18 : vector<1x4x16xf32> to vector<4x16xf32>
    %c0_21 = arith.constant 0 : index
    %c218 = arith.constant 218 : index
    %20 = vector.load %arg9[%c0_21, %c218] : memref<8x896xf32, #tpu.memory_space<vmem>>, vector<4x16xf32>
    tpu.vector_store %arg9[%c0_21, %c218], %19 {strides = array<i32>} : memref<8x896xf32, #tpu.memory_space<vmem>>, vector<4x16xf32>,
    %c0_22 = arith.constant 0 : index
    %c0_23 = arith.constant 0 : index
    %c96 = arith.constant 96 : index
    %21 = vector.load %arg0[%c0_22, %c0_23, %c96] : memref<2x4x256xf32, #tpu.memory_space<vmem>>, vector<1x4x16xf32>
    %22 = vector.shape_cast %21 : vector<1x4x16xf32> to vector<4x16xf32>
    %c0_24 = arith.constant 0 : index
    %c236 = arith.constant 236 : index
    %23 = vector.load %arg9[%c0_24, %c236] : memref<8x896xf32, #tpu.memory_space<vmem>>, vector<4x16xf32>
    tpu.vector_store %arg9[%c0_24, %c236], %22 {strides = array<i32>} : memref<8x896xf32, #tpu.memory_space<vmem>>, vector<4x16xf32>,
    %c0_25 = arith.constant 0 : index
    %c0_26 = arith.constant 0 : index
    %c112 = arith.constant 112 : index
    %24 = vector.load %arg0[%c0_25, %c0_26, %c112] : memref<2x4x256xf32, #tpu.memory_space<vmem>>, vector<1x4x16xf32>
    %25 = vector.shape_cast %24 : vector<1x4x16xf32> to vector<4x16xf32>
    %c0_27 = arith.constant 0 : index
    %c254 = arith.constant 254 : index
    %26 = vector.load %arg9[%c0_27, %c254] : memref<8x896xf32, #tpu.memory_space<vmem>>, vector<4x16xf32>
    tpu.vector_store %arg9[%c0_27, %c254], %25 {strides = array<i32>} : memref<8x896xf32, #tpu.memory_space<vmem>>, vector<4x16xf32>,
    %c0_28 = arith.constant 0 : index
    %c0_29 = arith.constant 0 : index
    %c128_30 = arith.constant 128 : index
    %27 = vector.load %arg0[%c0_28, %c0_29, %c128_30] : memref<2x4x256xf32, #tpu.memory_space<vmem>>, vector<1x4x16xf32>
    %28 = vector.shape_cast %27 : vector<1x4x16xf32> to vector<4x16xf32>
    %c0_31 = arith.constant 0 : index
    %c272 = arith.constant 272 : index
    %29 = vector.load %arg9[%c0_31, %c272] : memref<8x896xf32, #tpu.memory_space<vmem>>, vector<4x16xf32>
    tpu.vector_store %arg9[%c0_31, %c272], %28 {strides = array<i32>} : memref<8x896xf32, #tpu.memory_space<vmem>>, vector<4x16xf32>,
    %c0_32 = arith.constant 0 : index
    %c0_33 = arith.constant 0 : index
    %c144 = arith.constant 144 : index
    %30 = vector.load %arg0[%c0_32, %c0_33, %c144] : memref<2x4x256xf32, #tpu.memory_space<vmem>>, vector<1x4x16xf32>
    %31 = vector.shape_cast %30 : vector<1x4x16xf32> to vector<4x16xf32>
    %c0_34 = arith.constant 0 : index
    %c290 = arith.constant 290 : index
    %32 = vector.load %arg9[%c0_34, %c290] : memref<8x896xf32, #tpu.memory_space<vmem>>, vector<4x16xf32>
    tpu.vector_store %arg9[%c0_34, %c290], %31 {strides = array<i32>} : memref<8x896xf32, #tpu.memory_space<vmem>>, vector<4x16xf32>,
    %c0_35 = arith.constant 0 : index
    %c0_36 = arith.constant 0 : index
    %c160 = arith.constant 160 : index
    %33 = vector.load %arg0[%c0_35, %c0_36, %c160] : memref<2x4x256xf32, #tpu.memory_space<vmem>>, vector<1x4x16xf32>
    %34 = vector.shape_cast %33 : vector<1x4x16xf32> to vector<4x16xf32>
    %c0_37 = arith.constant 0 : index
    %c308 = arith.constant 308 : index
    %35 = vector.load %arg9[%c0_37, %c308] : memref<8x896xf32, #tpu.memory_space<vmem>>, vector<4x16xf32>
    tpu.vector_store %arg9[%c0_37, %c308], %34 {strides = array<i32>} : memref<8x896xf32, #tpu.memory_space<vmem>>, vector<4x16xf32>,
    %c0_38 = arith.constant 0 : index
    %c0_39 = arith.constant 0 : index
    %c176 = arith.constant 176 : index
    %36 = vector.load %arg0[%c0_38, %c0_39, %c176] : memref<2x4x256xf32, #tpu.memory_space<vmem>>, vector<1x4x16xf32>
    %37 = vector.shape_cast %36 : vector<1x4x16xf32> to vector<4x16xf32>
    %c0_40 = arith.constant 0 : index
    %c326 = arith.constant 326 : index
    %38 = vector.load %arg9[%c0_40, %c326] : memref<8x896xf32, #tpu.memory_space<vmem>>, vector<4x16xf32>
    tpu.vector_store %arg9[%c0_40, %c326], %37 {strides = array<i32>} : memref<8x896xf32, #tpu.memory_space<vmem>>, vector<4x16xf32>,
    %c0_41 = arith.constant 0 : index
    %c0_42 = arith.constant 0 : index
    %c192 = arith.constant 192 : index
    %39 = vector.load %arg0[%c0_41, %c0_42, %c192] : memref<2x4x256xf32, #tpu.memory_space<vmem>>, vector<1x4x16xf32>
    %40 = vector.shape_cast %39 : vector<1x4x16xf32> to vector<4x16xf32>
    %c0_43 = arith.constant 0 : index
    %c344 = arith.constant 344 : index
    %41 = vector.load %arg9[%c0_43, %c344] : memref<8x896xf32, #tpu.memory_space<vmem>>, vector<4x16xf32>
    tpu.vector_store %arg9[%c0_43, %c344], %40 {strides = array<i32>} : memref<8x896xf32, #tpu.memory_space<vmem>>, vector<4x16xf32>,
    %c0_44 = arith.constant 0 : index
    %c0_45 = arith.constant 0 : index
    %c208 = arith.constant 208 : index
    %42 = vector.load %arg0[%c0_44, %c0_45, %c208] : memref<2x4x256xf32, #tpu.memory_space<vmem>>, vector<1x4x16xf32>
    %43 = vector.shape_cast %42 : vector<1x4x16xf32> to vector<4x16xf32>
    %c0_46 = arith.constant 0 : index
    %c362 = arith.constant 362 : index
    %44 = vector.load %arg9[%c0_46, %c362] : memref<8x896xf32, #tpu.memory_space<vmem>>, vector<4x16xf32>
    tpu.vector_store %arg9[%c0_46, %c362], %43 {strides = array<i32>} : memref<8x896xf32, #tpu.memory_space<vmem>>, vector<4x16xf32>,
    %c0_47 = arith.constant 0 : index
    %c0_48 = arith.constant 0 : index
    %c224 = arith.constant 224 : index
    %45 = vector.load %arg0[%c0_47, %c0_48, %c224] : memref<2x4x256xf32, #tpu.memory_space<vmem>>, vector<1x4x16xf32>
    %46 = vector.shape_cast %45 : vector<1x4x16xf32> to vector<4x16xf32>
    %c0_49 = arith.constant 0 : index
    %c380 = arith.constant 380 : index
    %47 = vector.load %arg9[%c0_49, %c380] : memref<8x896xf32, #tpu.memory_space<vmem>>, vector<4x16xf32>
    tpu.vector_store %arg9[%c0_49, %c380], %46 {strides = array<i32>} : memref<8x896xf32, #tpu.memory_space<vmem>>, vector<4x16xf32>,
    %c0_50 = arith.constant 0 : index
    %c0_51 = arith.constant 0 : index
    %c240 = arith.constant 240 : index
    %48 = vector.load %arg0[%c0_50, %c0_51, %c240] : memref<2x4x256xf32, #tpu.memory_space<vmem>>, vector<1x4x16xf32>
    %49 = vector.shape_cast %48 : vector<1x4x16xf32> to vector<4x16xf32>
    %c0_52 = arith.constant 0 : index
    %c398 = arith.constant 398 : index
    %50 = vector.load %arg9[%c0_52, %c398] : memref<8x896xf32, #tpu.memory_space<vmem>>, vector<4x16xf32>
    tpu.vector_store %arg9[%c0_52, %c398], %49 {strides = array<i32>} : memref<8x896xf32, #tpu.memory_space<vmem>>, vector<4x16xf32>,
    %c1 = arith.constant 1 : index
    %c0_53 = arith.constant 0 : index
    %c0_54 = arith.constant 0 : index
    %51 = vector.load %arg0[%c1, %c0_53, %c0_54] : memref<2x4x256xf32, #tpu.memory_space<vmem>>, vector<1x4x16xf32>
    %52 = vector.shape_cast %51 : vector<1x4x16xf32> to vector<4x16xf32>
    %c0_55 = arith.constant 0 : index
    %c452 = arith.constant 452 : index
    %53 = vector.load %arg9[%c0_55, %c452] : memref<8x896xf32, #tpu.memory_space<vmem>>, vector<4x16xf32>
    tpu.vector_store %arg9[%c0_55, %c452], %52 {strides = array<i32>} : memref<8x896xf32, #tpu.memory_space<vmem>>, vector<4x16xf32>,
    %c1_56 = arith.constant 1 : index
    %c0_57 = arith.constant 0 : index
    %c16_58 = arith.constant 16 : index
    %54 = vector.load %arg0[%c1_56, %c0_57, %c16_58] : memref<2x4x256xf32, #tpu.memory_space<vmem>>, vector<1x4x16xf32>
    %55 = vector.shape_cast %54 : vector<1x4x16xf32> to vector<4x16xf32>
    %c0_59 = arith.constant 0 : index
    %c470 = arith.constant 470 : index
    %56 = vector.load %arg9[%c0_59, %c470] : memref<8x896xf32, #tpu.memory_space<vmem>>, vector<4x16xf32>
    tpu.vector_store %arg9[%c0_59, %c470], %55 {strides = array<i32>} : memref<8x896xf32, #tpu.memory_space<vmem>>, vector<4x16xf32>,
    %c1_60 = arith.constant 1 : index
    %c0_61 = arith.constant 0 : index
    %c32_62 = arith.constant 32 : index
    %57 = vector.load %arg0[%c1_60, %c0_61, %c32_62] : memref<2x4x256xf32, #tpu.memory_space<vmem>>, vector<1x4x16xf32>
    %58 = vector.shape_cast %57 : vector<1x4x16xf32> to vector<4x16xf32>
    %c0_63 = arith.constant 0 : index
    %c488 = arith.constant 488 : index
    %59 = vector.load %arg9[%c0_63, %c488] : memref<8x896xf32, #tpu.memory_space<vmem>>, vector<4x16xf32>
    tpu.vector_store %arg9[%c0_63, %c488], %58 {strides = array<i32>} : memref<8x896xf32, #tpu.memory_space<vmem>>, vector<4x16xf32>,
    %c1_64 = arith.constant 1 : index
    %c0_65 = arith.constant 0 : index
    %c48_66 = arith.constant 48 : index
    %60 = vector.load %arg0[%c1_64, %c0_65, %c48_66] : memref<2x4x256xf32, #tpu.memory_space<vmem>>, vector<1x4x16xf32>
    %61 = vector.shape_cast %60 : vector<1x4x16xf32> to vector<4x16xf32>
    %c0_67 = arith.constant 0 : index
    %c506 = arith.constant 506 : index
    %62 = vector.load %arg9[%c0_67, %c506] : memref<8x896xf32, #tpu.memory_space<vmem>>, vector<4x16xf32>
    tpu.vector_store %arg9[%c0_67, %c506], %61 {strides = array<i32>} : memref<8x896xf32, #tpu.memory_space<vmem>>, vector<4x16xf32>,
    %c1_68 = arith.constant 1 : index
    %c0_69 = arith.constant 0 : index
    %c64_70 = arith.constant 64 : index
    %63 = vector.load %arg0[%c1_68, %c0_69, %c64_70] : memref<2x4x256xf32, #tpu.memory_space<vmem>>, vector<1x4x16xf32>
    %64 = vector.shape_cast %63 : vector<1x4x16xf32> to vector<4x16xf32>
    %c0_71 = arith.constant 0 : index
    %c524 = arith.constant 524 : index
    %65 = vector.load %arg9[%c0_71, %c524] : memref<8x896xf32, #tpu.memory_space<vmem>>, vector<4x16xf32>
    tpu.vector_store %arg9[%c0_71, %c524], %64 {strides = array<i32>} : memref<8x896xf32, #tpu.memory_space<vmem>>, vector<4x16xf32>,
    %c1_72 = arith.constant 1 : index
    %c0_73 = arith.constant 0 : index
    %c80_74 = arith.constant 80 : index
    %66 = vector.load %arg0[%c1_72, %c0_73, %c80_74] : memref<2x4x256xf32, #tpu.memory_space<vmem>>, vector<1x4x16xf32>
    %67 = vector.shape_cast %66 : vector<1x4x16xf32> to vector<4x16xf32>
    %c0_75 = arith.constant 0 : index
    %c542 = arith.constant 542 : index
    %68 = vector.load %arg9[%c0_75, %c542] : memref<8x896xf32, #tpu.memory_space<vmem>>, vector<4x16xf32>
    tpu.vector_store %arg9[%c0_75, %c542], %67 {strides = array<i32>} : memref<8x896xf32, #tpu.memory_space<vmem>>, vector<4x16xf32>,
    %c1_76 = arith.constant 1 : index
    %c0_77 = arith.constant 0 : index
    %c96_78 = arith.constant 96 : index
    %69 = vector.load %arg0[%c1_76, %c0_77, %c96_78] : memref<2x4x256xf32, #tpu.memory_space<vmem>>, vector<1x4x16xf32>
    %70 = vector.shape_cast %69 : vector<1x4x16xf32> to vector<4x16xf32>
    %c0_79 = arith.constant 0 : index
    %c560 = arith.constant 560 : index
    %71 = vector.load %arg9[%c0_79, %c560] : memref<8x896xf32, #tpu.memory_space<vmem>>, vector<4x16xf32>
    tpu.vector_store %arg9[%c0_79, %c560], %70 {strides = array<i32>} : memref<8x896xf32, #tpu.memory_space<vmem>>, vector<4x16xf32>,
    %c1_80 = arith.constant 1 : index
    %c0_81 = arith.constant 0 : index
    %c112_82 = arith.constant 112 : index
    %72 = vector.load %arg0[%c1_80, %c0_81, %c112_82] : memref<2x4x256xf32, #tpu.memory_space<vmem>>, vector<1x4x16xf32>
    %73 = vector.shape_cast %72 : vector<1x4x16xf32> to vector<4x16xf32>
    %c0_83 = arith.constant 0 : index
    %c578 = arith.constant 578 : index
    %74 = vector.load %arg9[%c0_83, %c578] : memref<8x896xf32, #tpu.memory_space<vmem>>, vector<4x16xf32>
    tpu.vector_store %arg9[%c0_83, %c578], %73 {strides = array<i32>} : memref<8x896xf32, #tpu.memory_space<vmem>>, vector<4x16xf32>,
    %c1_84 = arith.constant 1 : index
    %c0_85 = arith.constant 0 : index
    %c128_86 = arith.constant 128 : index
    %75 = vector.load %arg0[%c1_84, %c0_85, %c128_86] : memref<2x4x256xf32, #tpu.memory_space<vmem>>, vector<1x4x16xf32>
    %76 = vector.shape_cast %75 : vector<1x4x16xf32> to vector<4x16xf32>
    %c0_87 = arith.constant 0 : index
    %c596 = arith.constant 596 : index
    %77 = vector.load %arg9[%c0_87, %c596] : memref<8x896xf32, #tpu.memory_space<vmem>>, vector<4x16xf32>
    tpu.vector_store %arg9[%c0_87, %c596], %76 {strides = array<i32>} : memref<8x896xf32, #tpu.memory_space<vmem>>, vector<4x16xf32>,
    %c1_88 = arith.constant 1 : index
    %c0_89 = arith.constant 0 : index
    %c144_90 = arith.constant 144 : index
    %78 = vector.load %arg0[%c1_88, %c0_89, %c144_90] : memref<2x4x256xf32, #tpu.memory_space<vmem>>, vector<1x4x16xf32>
    %79 = vector.shape_cast %78 : vector<1x4x16xf32> to vector<4x16xf32>
    %c0_91 = arith.constant 0 : index
    %c614 = arith.constant 614 : index
    %80 = vector.load %arg9[%c0_91, %c614] : memref<8x896xf32, #tpu.memory_space<vmem>>, vector<4x16xf32>
    tpu.vector_store %arg9[%c0_91, %c614], %79 {strides = array<i32>} : memref<8x896xf32, #tpu.memory_space<vmem>>, vector<4x16xf32>,
    %c1_92 = arith.constant 1 : index
    %c0_93 = arith.constant 0 : index
    %c160_94 = arith.constant 160 : index
    %81 = vector.load %arg0[%c1_92, %c0_93, %c160_94] : memref<2x4x256xf32, #tpu.memory_space<vmem>>, vector<1x4x16xf32>
    %82 = vector.shape_cast %81 : vector<1x4x16xf32> to vector<4x16xf32>
    %c0_95 = arith.constant 0 : index
    %c632 = arith.constant 632 : index
    %83 = vector.load %arg9[%c0_95, %c632] : memref<8x896xf32, #tpu.memory_space<vmem>>, vector<4x16xf32>
    tpu.vector_store %arg9[%c0_95, %c632], %82 {strides = array<i32>} : memref<8x896xf32, #tpu.memory_space<vmem>>, vector<4x16xf32>,
    %c1_96 = arith.constant 1 : index
    %c0_97 = arith.constant 0 : index
    %c176_98 = arith.constant 176 : index
    %84 = vector.load %arg0[%c1_96, %c0_97, %c176_98] : memref<2x4x256xf32, #tpu.memory_space<vmem>>, vector<1x4x16xf32>
    %85 = vector.shape_cast %84 : vector<1x4x16xf32> to vector<4x16xf32>
    %c0_99 = arith.constant 0 : index
    %c650 = arith.constant 650 : index
    %86 = vector.load %arg9[%c0_99, %c650] : memref<8x896xf32, #tpu.memory_space<vmem>>, vector<4x16xf32>
    tpu.vector_store %arg9[%c0_99, %c650], %85 {strides = array<i32>} : memref<8x896xf32, #tpu.memory_space<vmem>>, vector<4x16xf32>,
    %c1_100 = arith.constant 1 : index
    %c0_101 = arith.constant 0 : index
    %c192_102 = arith.constant 192 : index
    %87 = vector.load %arg0[%c1_100, %c0_101, %c192_102] : memref<2x4x256xf32, #tpu.memory_space<vmem>>, vector<1x4x16xf32>
    %88 = vector.shape_cast %87 : vector<1x4x16xf32> to vector<4x16xf32>
    %c0_103 = arith.constant 0 : index
    %c668 = arith.constant 668 : index
    %89 = vector.load %arg9[%c0_103, %c668] : memref<8x896xf32, #tpu.memory_space<vmem>>, vector<4x16xf32>
    tpu.vector_store %arg9[%c0_103, %c668], %88 {strides = array<i32>} : memref<8x896xf32, #tpu.memory_space<vmem>>, vector<4x16xf32>,
    %c1_104 = arith.constant 1 : index
    %c0_105 = arith.constant 0 : index
    %c208_106 = arith.constant 208 : index
    %90 = vector.load %arg0[%c1_104, %c0_105, %c208_106] : memref<2x4x256xf32, #tpu.memory_space<vmem>>, vector<1x4x16xf32>
    %91 = vector.shape_cast %90 : vector<1x4x16xf32> to vector<4x16xf32>
    %c0_107 = arith.constant 0 : index
    %c686 = arith.constant 686 : index
    %92 = vector.load %arg9[%c0_107, %c686] : memref<8x896xf32, #tpu.memory_space<vmem>>, vector<4x16xf32>
    tpu.vector_store %arg9[%c0_107, %c686], %91 {strides = array<i32>} : memref<8x896xf32, #tpu.memory_space<vmem>>, vector<4x16xf32>,
    %c1_108 = arith.constant 1 : index
    %c0_109 = arith.constant 0 : index
    %c224_110 = arith.constant 224 : index
    %93 = vector.load %arg0[%c1_108, %c0_109, %c224_110] : memref<2x4x256xf32, #tpu.memory_space<vmem>>, vector<1x4x16xf32>
    %94 = vector.shape_cast %93 : vector<1x4x16xf32> to vector<4x16xf32>
    %c0_111 = arith.constant 0 : index
    %c704 = arith.constant 704 : index
    %95 = vector.load %arg9[%c0_111, %c704] : memref<8x896xf32, #tpu.memory_space<vmem>>, vector<4x16xf32>
    tpu.vector_store %arg9[%c0_111, %c704], %94 {strides = array<i32>} : memref<8x896xf32, #tpu.memory_space<vmem>>, vector<4x16xf32>,
    %c1_112 = arith.constant 1 : index
    %c0_113 = arith.constant 0 : index
    %c240_114 = arith.constant 240 : index
    %96 = vector.load %arg0[%c1_112, %c0_113, %c240_114] : memref<2x4x256xf32, #tpu.memory_space<vmem>>, vector<1x4x16xf32>
    %97 = vector.shape_cast %96 : vector<1x4x16xf32> to vector<4x16xf32>
    %c0_115 = arith.constant 0 : index
    %c722 = arith.constant 722 : index
    %98 = vector.load %arg9[%c0_115, %c722] : memref<8x896xf32, #tpu.memory_space<vmem>>, vector<4x16xf32>
    tpu.vector_store %arg9[%c0_115, %c722], %97 {strides = array<i32>} : memref<8x896xf32, #tpu.memory_space<vmem>>, vector<4x16xf32>,
    %c0_116 = arith.constant 0 : index
    %c0_117 = arith.constant 0 : index
    %c0_118 = arith.constant 0 : index
    %99 = vector.load %arg2[%c0_116, %c0_117, %c0_118] : memref<9x8x8xf32, #tpu.memory_space<vmem>>, vector<1x8x8xf32>
    %100 = vector.shape_cast %99 : vector<1x8x8xf32> to vector<8x8xf32>
    %c0_119 = arith.constant 0 : index
    %c109 = arith.constant 109 : index
    %101 = vector.load %arg9[%c0_119, %c109] : memref<8x896xf32, #tpu.memory_space<vmem>>, vector<8x640xf32>
    %cst_120 = arith.constant dense<0.000000e+00> : vector<8x640xf32>
    %102 = tpu.matmul %100, %101, %cst_120 {dimension_numbers = #tpu.dot_dimension_numbers<[1], [0], [0], [1], [0, 0, 1, 1], [], []>} : vector<8x8xf32>, vector<8x640xf32>, vector<8x640xf32> -> vector<8x640xf32>
    %c1_121 = arith.constant 1 : index
    %c0_122 = arith.constant 0 : index
    %c0_123 = arith.constant 0 : index
    %103 = vector.load %arg2[%c1_121, %c0_122, %c0_123] : memref<9x8x8xf32, #tpu.memory_space<vmem>>, vector<1x8x8xf32>
    %104 = vector.shape_cast %103 : vector<1x8x8xf32> to vector<8x8xf32>
    %c0_124 = arith.constant 0 : index
    %c110 = arith.constant 110 : index
    %105 = vector.load %arg9[%c0_124, %c110] : memref<8x896xf32, #tpu.memory_space<vmem>>, vector<8x640xf32>
    %cst_125 = arith.constant dense<0.000000e+00> : vector<8x640xf32>
    %106 = tpu.matmul %104, %105, %cst_125 {dimension_numbers = #tpu.dot_dimension_numbers<[1], [0], [0], [1], [0, 0, 1, 1], [], []>} : vector<8x8xf32>, vector<8x640xf32>, vector<8x640xf32> -> vector<8x640xf32>
    %107 = arith.addf %102, %106 : vector<8x640xf32>
    %c2 = arith.constant 2 : index
    %c0_126 = arith.constant 0 : index
    %c0_127 = arith.constant 0 : index
    %108 = vector.load %arg2[%c2, %c0_126, %c0_127] : memref<9x8x8xf32, #tpu.memory_space<vmem>>, vector<1x8x8xf32>
    %109 = vector.shape_cast %108 : vector<1x8x8xf32> to vector<8x8xf32>
    %c0_128 = arith.constant 0 : index
    %c111 = arith.constant 111 : index
    %110 = vector.load %arg9[%c0_128, %c111] : memref<8x896xf32, #tpu.memory_space<vmem>>, vector<8x640xf32>
    %cst_129 = arith.constant dense<0.000000e+00> : vector<8x640xf32>
    %111 = tpu.matmul %109, %110, %cst_129 {dimension_numbers = #tpu.dot_dimension_numbers<[1], [0], [0], [1], [0, 0, 1, 1], [], []>} : vector<8x8xf32>, vector<8x640xf32>, vector<8x640xf32> -> vector<8x640xf32>
    %112 = arith.addf %107, %111 : vector<8x640xf32>
    %c3 = arith.constant 3 : index
    %c0_130 = arith.constant 0 : index
    %c0_131 = arith.constant 0 : index
    %113 = vector.load %arg2[%c3, %c0_130, %c0_131] : memref<9x8x8xf32, #tpu.memory_space<vmem>>, vector<1x8x8xf32>
    %114 = vector.shape_cast %113 : vector<1x8x8xf32> to vector<8x8xf32>
    %c0_132 = arith.constant 0 : index
    %c127 = arith.constant 127 : index
    %115 = vector.load %arg9[%c0_132, %c127] : memref<8x896xf32, #tpu.memory_space<vmem>>, vector<8x640xf32>
    %cst_133 = arith.constant dense<0.000000e+00> : vector<8x640xf32>
    %116 = tpu.matmul %114, %115, %cst_133 {dimension_numbers = #tpu.dot_dimension_numbers<[1], [0], [0], [1], [0, 0, 1, 1], [], []>} : vector<8x8xf32>, vector<8x640xf32>, vector<8x640xf32> -> vector<8x640xf32>
    %117 = arith.addf %112, %116 : vector<8x640xf32>
    %c4 = arith.constant 4 : index
    %c0_134 = arith.constant 0 : index
    %c0_135 = arith.constant 0 : index
    %118 = vector.load %arg2[%c4, %c0_134, %c0_135] : memref<9x8x8xf32, #tpu.memory_space<vmem>>, vector<1x8x8xf32>
    %119 = vector.shape_cast %118 : vector<1x8x8xf32> to vector<8x8xf32>
    %c0_136 = arith.constant 0 : index
    %c128_137 = arith.constant 128 : index
    %120 = vector.load %arg9[%c0_136, %c128_137] : memref<8x896xf32, #tpu.memory_space<vmem>>, vector<8x640xf32>
    %cst_138 = arith.constant dense<0.000000e+00> : vector<8x640xf32>
    %121 = tpu.matmul %119, %120, %cst_138 {dimension_numbers = #tpu.dot_dimension_numbers<[1], [0], [0], [1], [0, 0, 1, 1], [], []>} : vector<8x8xf32>, vector<8x640xf32>, vector<8x640xf32> -> vector<8x640xf32>
    %122 = arith.addf %117, %121 : vector<8x640xf32>
    %c5 = arith.constant 5 : index
    %c0_139 = arith.constant 0 : index
    %c0_140 = arith.constant 0 : index
    %123 = vector.load %arg2[%c5, %c0_139, %c0_140] : memref<9x8x8xf32, #tpu.memory_space<vmem>>, vector<1x8x8xf32>
    %124 = vector.shape_cast %123 : vector<1x8x8xf32> to vector<8x8xf32>
    %c0_141 = arith.constant 0 : index
    %c129 = arith.constant 129 : index
    %125 = vector.load %arg9[%c0_141, %c129] : memref<8x896xf32, #tpu.memory_space<vmem>>, vector<8x640xf32>
    %cst_142 = arith.constant dense<0.000000e+00> : vector<8x640xf32>
    %126 = tpu.matmul %124, %125, %cst_142 {dimension_numbers = #tpu.dot_dimension_numbers<[1], [0], [0], [1], [0, 0, 1, 1], [], []>} : vector<8x8xf32>, vector<8x640xf32>, vector<8x640xf32> -> vector<8x640xf32>
    %127 = arith.addf %122, %126 : vector<8x640xf32>
    %c6 = arith.constant 6 : index
    %c0_143 = arith.constant 0 : index
    %c0_144 = arith.constant 0 : index
    %128 = vector.load %arg2[%c6, %c0_143, %c0_144] : memref<9x8x8xf32, #tpu.memory_space<vmem>>, vector<1x8x8xf32>
    %129 = vector.shape_cast %128 : vector<1x8x8xf32> to vector<8x8xf32>
    %c0_145 = arith.constant 0 : index
    %c145 = arith.constant 145 : index
    %130 = vector.load %arg9[%c0_145, %c145] : memref<8x896xf32, #tpu.memory_space<vmem>>, vector<8x640xf32>
    %cst_146 = arith.constant dense<0.000000e+00> : vector<8x640xf32>
    %131 = tpu.matmul %129, %130, %cst_146 {dimension_numbers = #tpu.dot_dimension_numbers<[1], [0], [0], [1], [0, 0, 1, 1], [], []>} : vector<8x8xf32>, vector<8x640xf32>, vector<8x640xf32> -> vector<8x640xf32>
    %132 = arith.addf %127, %131 : vector<8x640xf32>
    %c7 = arith.constant 7 : index
    %c0_147 = arith.constant 0 : index
    %c0_148 = arith.constant 0 : index
    %133 = vector.load %arg2[%c7, %c0_147, %c0_148] : memref<9x8x8xf32, #tpu.memory_space<vmem>>, vector<1x8x8xf32>
    %134 = vector.shape_cast %133 : vector<1x8x8xf32> to vector<8x8xf32>
    %c0_149 = arith.constant 0 : index
    %c146_150 = arith.constant 146 : index
    %135 = vector.load %arg9[%c0_149, %c146_150] : memref<8x896xf32, #tpu.memory_space<vmem>>, vector<8x640xf32>
    %cst_151 = arith.constant dense<0.000000e+00> : vector<8x640xf32>
    %136 = tpu.matmul %134, %135, %cst_151 {dimension_numbers = #tpu.dot_dimension_numbers<[1], [0], [0], [1], [0, 0, 1, 1], [], []>} : vector<8x8xf32>, vector<8x640xf32>, vector<8x640xf32> -> vector<8x640xf32>
    %137 = arith.addf %132, %136 : vector<8x640xf32>
    %c8 = arith.constant 8 : index
    %c0_152 = arith.constant 0 : index
    %c0_153 = arith.constant 0 : index
    %138 = vector.load %arg2[%c8, %c0_152, %c0_153] : memref<9x8x8xf32, #tpu.memory_space<vmem>>, vector<1x8x8xf32>
    %139 = vector.shape_cast %138 : vector<1x8x8xf32> to vector<8x8xf32>
    %c0_154 = arith.constant 0 : index
    %c147 = arith.constant 147 : index
    %140 = vector.load %arg9[%c0_154, %c147] : memref<8x896xf32, #tpu.memory_space<vmem>>, vector<8x640xf32>
    %cst_155 = arith.constant dense<0.000000e+00> : vector<8x640xf32>
    %141 = tpu.matmul %139, %140, %cst_155 {dimension_numbers = #tpu.dot_dimension_numbers<[1], [0], [0], [1], [0, 0, 1, 1], [], []>} : vector<8x8xf32>, vector<8x640xf32>, vector<8x640xf32> -> vector<8x640xf32>
    %142 = arith.addf %137, %141 : vector<8x640xf32>
    %143 = vector.broadcast %0 : vector<1x640xf32> to vector<8x640xf32>
    %144 = arith.mulf %142, %143 : vector<8x640xf32>
    %cst_156 = arith.constant dense<0.000000e+00> : vector<8xf32>
    %145 = vector.multi_reduction <add>, %144, %cst_156 [1] : vector<8x640xf32> to vector<8xf32>
    %146 = vector.shape_cast %145 : vector<8xf32> to vector<8x1xf32>
    %147 = arith.mulf %144, %142 : vector<8x640xf32>
    %cst_157 = arith.constant dense<0.000000e+00> : vector<8xf32>
    %148 = vector.multi_reduction <add>, %147, %cst_157 [1] : vector<8x640xf32> to vector<8xf32>
    %149 = vector.shape_cast %148 : vector<8xf32> to vector<8x1xf32>
    %cst_158 = arith.constant 5.120000e+02 : f32
    %150 = vector.broadcast %cst_158 : f32 to vector<8x1xf32>
    %151 = arith.divf %146, %150 : vector<8x1xf32>
    %cst_159 = arith.constant 5.120000e+02 : f32
    %152 = vector.broadcast %cst_159 : f32 to vector<8x1xf32>
    %153 = arith.divf %149, %152 : vector<8x1xf32>
    %154 = arith.mulf %151, %151 : vector<8x1xf32>
    %155 = arith.subf %153, %154 : vector<8x1xf32>
    %c0_160 = arith.constant 0 : index
    %c0_161 = arith.constant 0 : index
    %156 = vector.load %arg3[%c0_160, %c0_161] : memref<8x1xf32, #tpu.memory_space<vmem>>, vector<8x1xf32>
    %cst_162 = arith.constant 9.99999974E-6 : f32
    %157 = vector.broadcast %cst_162 : f32 to vector<8x1xf32>
    %158 = arith.addf %155, %157 : vector<8x1xf32>
    %159 = math.rsqrt %158 : vector<8x1xf32>
    %160 = arith.mulf %156, %159 : vector<8x1xf32>
    %c0_163 = arith.constant 0 : index
    %c0_164 = arith.constant 0 : index
    %161 = vector.load %arg4[%c0_163, %c0_164] : memref<8x1xf32, #tpu.memory_space<vmem>>, vector<8x1xf32>
    %162 = arith.mulf %151, %160 : vector<8x1xf32>
    %163 = arith.subf %161, %162 : vector<8x1xf32>
    %164 = vector.broadcast %160 : vector<8x1xf32> to vector<8x640xf32>
    %165 = arith.mulf %142, %164 : vector<8x640xf32>
    %166 = vector.broadcast %163 : vector<8x1xf32> to vector<8x640xf32>
    %167 = arith.addf %165, %166 : vector<8x640xf32>
    %cst_165 = arith.constant 0.000000e+00 : f32
    %168 = vector.broadcast %cst_165 : f32 to vector<8x640xf32>
    %169 = arith.maximumf %167, %168 : vector<8x640xf32>
    %cst_166 = arith.constant 0.000000e+00 : f32
    %170 = vector.broadcast %cst_166 : f32 to vector<8x128xf32>
    %c0_167 = arith.constant 0 : index
    %c0_168 = arith.constant 0 : index
    %171 = vector.load %arg10[%c0_167, %c0_168] : memref<8x896xf32, #tpu.memory_space<vmem>>, vector<8x128xf32>
    tpu.vector_store %arg10[%c0_167, %c0_168], %170 {strides = array<i32>} : memref<8x896xf32, #tpu.memory_space<vmem>>, vector<8x128xf32>,
    %cst_169 = arith.constant 0.000000e+00 : f32
    %172 = vector.broadcast %cst_169 : f32 to vector<8x128xf32>
    %c0_170 = arith.constant 0 : index
    %c768 = arith.constant 768 : index
    %173 = vector.load %arg10[%c0_170, %c768] : memref<8x896xf32, #tpu.memory_space<vmem>>, vector<8x128xf32>
    tpu.vector_store %arg10[%c0_170, %c768], %172 {strides = array<i32>} : memref<8x896xf32, #tpu.memory_space<vmem>>, vector<8x128xf32>,
    %174 = vector.broadcast %0 : vector<1x640xf32> to vector<8x640xf32>
    %175 = arith.mulf %169, %174 : vector<8x640xf32>
    %c0_171 = arith.constant 0 : index
    %c128_172 = arith.constant 128 : index
    %176 = vector.load %arg10[%c0_171, %c128_172] : memref<8x896xf32, #tpu.memory_space<vmem>>, vector<8x640xf32>
    tpu.vector_store %arg10[%c0_171, %c128_172], %175 {strides = array<i32>} : memref<8x896xf32, #tpu.memory_space<vmem>>, vector<8x640xf32>,
    %c0_173 = arith.constant 0 : index
    %c0_174 = arith.constant 0 : index
    %c0_175 = arith.constant 0 : index
    %177 = vector.load %arg5[%c0_173, %c0_174, %c0_175] : memref<9x8x8xf32, #tpu.memory_space<vmem>>, vector<1x8x8xf32>
    %178 = vector.shape_cast %177 : vector<1x8x8xf32> to vector<8x8xf32>
    %c0_176 = arith.constant 0 : index
    %c109_177 = arith.constant 109 : index
    %179 = vector.load %arg10[%c0_176, %c109_177] : memref<8x896xf32, #tpu.memory_space<vmem>>, vector<8x640xf32>
    %cst_178 = arith.constant dense<0.000000e+00> : vector<8x640xf32>
    %180 = tpu.matmul %178, %179, %cst_178 {dimension_numbers = #tpu.dot_dimension_numbers<[1], [0], [0], [1], [0, 0, 1, 1], [], []>} : vector<8x8xf32>, vector<8x640xf32>, vector<8x640xf32> -> vector<8x640xf32>
    %c1_179 = arith.constant 1 : index
    %c0_180 = arith.constant 0 : index
    %c0_181 = arith.constant 0 : index
    %181 = vector.load %arg5[%c1_179, %c0_180, %c0_181] : memref<9x8x8xf32, #tpu.memory_space<vmem>>, vector<1x8x8xf32>
    %182 = vector.shape_cast %181 : vector<1x8x8xf32> to vector<8x8xf32>
    %c0_182 = arith.constant 0 : index
    %c110_183 = arith.constant 110 : index
    %183 = vector.load %arg10[%c0_182, %c110_183] : memref<8x896xf32, #tpu.memory_space<vmem>>, vector<8x640xf32>
    %cst_184 = arith.constant dense<0.000000e+00> : vector<8x640xf32>
    %184 = tpu.matmul %182, %183, %cst_184 {dimension_numbers = #tpu.dot_dimension_numbers<[1], [0], [0], [1], [0, 0, 1, 1], [], []>} : vector<8x8xf32>, vector<8x640xf32>, vector<8x640xf32> -> vector<8x640xf32>
    %185 = arith.addf %180, %184 : vector<8x640xf32>
    %c2_185 = arith.constant 2 : index
    %c0_186 = arith.constant 0 : index
    %c0_187 = arith.constant 0 : index
    %186 = vector.load %arg5[%c2_185, %c0_186, %c0_187] : memref<9x8x8xf32, #tpu.memory_space<vmem>>, vector<1x8x8xf32>
    %187 = vector.shape_cast %186 : vector<1x8x8xf32> to vector<8x8xf32>
    %c0_188 = arith.constant 0 : index
    %c111_189 = arith.constant 111 : index
    %188 = vector.load %arg10[%c0_188, %c111_189] : memref<8x896xf32, #tpu.memory_space<vmem>>, vector<8x640xf32>
    %cst_190 = arith.constant dense<0.000000e+00> : vector<8x640xf32>
    %189 = tpu.matmul %187, %188, %cst_190 {dimension_numbers = #tpu.dot_dimension_numbers<[1], [0], [0], [1], [0, 0, 1, 1], [], []>} : vector<8x8xf32>, vector<8x640xf32>, vector<8x640xf32> -> vector<8x640xf32>
    %190 = arith.addf %185, %189 : vector<8x640xf32>
    %c3_191 = arith.constant 3 : index
    %c0_192 = arith.constant 0 : index
    %c0_193 = arith.constant 0 : index
    %191 = vector.load %arg5[%c3_191, %c0_192, %c0_193] : memref<9x8x8xf32, #tpu.memory_space<vmem>>, vector<1x8x8xf32>
    %192 = vector.shape_cast %191 : vector<1x8x8xf32> to vector<8x8xf32>
    %c0_194 = arith.constant 0 : index
    %c127_195 = arith.constant 127 : index
    %193 = vector.load %arg10[%c0_194, %c127_195] : memref<8x896xf32, #tpu.memory_space<vmem>>, vector<8x640xf32>
    %cst_196 = arith.constant dense<0.000000e+00> : vector<8x640xf32>
    %194 = tpu.matmul %192, %193, %cst_196 {dimension_numbers = #tpu.dot_dimension_numbers<[1], [0], [0], [1], [0, 0, 1, 1], [], []>} : vector<8x8xf32>, vector<8x640xf32>, vector<8x640xf32> -> vector<8x640xf32>
    %195 = arith.addf %190, %194 : vector<8x640xf32>
    %c4_197 = arith.constant 4 : index
    %c0_198 = arith.constant 0 : index
    %c0_199 = arith.constant 0 : index
    %196 = vector.load %arg5[%c4_197, %c0_198, %c0_199] : memref<9x8x8xf32, #tpu.memory_space<vmem>>, vector<1x8x8xf32>
    %197 = vector.shape_cast %196 : vector<1x8x8xf32> to vector<8x8xf32>
    %c0_200 = arith.constant 0 : index
    %c128_201 = arith.constant 128 : index
    %198 = vector.load %arg10[%c0_200, %c128_201] : memref<8x896xf32, #tpu.memory_space<vmem>>, vector<8x640xf32>
    %cst_202 = arith.constant dense<0.000000e+00> : vector<8x640xf32>
    %199 = tpu.matmul %197, %198, %cst_202 {dimension_numbers = #tpu.dot_dimension_numbers<[1], [0], [0], [1], [0, 0, 1, 1], [], []>} : vector<8x8xf32>, vector<8x640xf32>, vector<8x640xf32> -> vector<8x640xf32>
    %200 = arith.addf %195, %199 : vector<8x640xf32>
    %c5_203 = arith.constant 5 : index
    %c0_204 = arith.constant 0 : index
    %c0_205 = arith.constant 0 : index
    %201 = vector.load %arg5[%c5_203, %c0_204, %c0_205] : memref<9x8x8xf32, #tpu.memory_space<vmem>>, vector<1x8x8xf32>
    %202 = vector.shape_cast %201 : vector<1x8x8xf32> to vector<8x8xf32>
    %c0_206 = arith.constant 0 : index
    %c129_207 = arith.constant 129 : index
    %203 = vector.load %arg10[%c0_206, %c129_207] : memref<8x896xf32, #tpu.memory_space<vmem>>, vector<8x640xf32>
    %cst_208 = arith.constant dense<0.000000e+00> : vector<8x640xf32>
    %204 = tpu.matmul %202, %203, %cst_208 {dimension_numbers = #tpu.dot_dimension_numbers<[1], [0], [0], [1], [0, 0, 1, 1], [], []>} : vector<8x8xf32>, vector<8x640xf32>, vector<8x640xf32> -> vector<8x640xf32>
    %205 = arith.addf %200, %204 : vector<8x640xf32>
    %c6_209 = arith.constant 6 : index
    %c0_210 = arith.constant 0 : index
    %c0_211 = arith.constant 0 : index
    %206 = vector.load %arg5[%c6_209, %c0_210, %c0_211] : memref<9x8x8xf32, #tpu.memory_space<vmem>>, vector<1x8x8xf32>
    %207 = vector.shape_cast %206 : vector<1x8x8xf32> to vector<8x8xf32>
    %c0_212 = arith.constant 0 : index
    %c145_213 = arith.constant 145 : index
    %208 = vector.load %arg10[%c0_212, %c145_213] : memref<8x896xf32, #tpu.memory_space<vmem>>, vector<8x640xf32>
    %cst_214 = arith.constant dense<0.000000e+00> : vector<8x640xf32>
    %209 = tpu.matmul %207, %208, %cst_214 {dimension_numbers = #tpu.dot_dimension_numbers<[1], [0], [0], [1], [0, 0, 1, 1], [], []>} : vector<8x8xf32>, vector<8x640xf32>, vector<8x640xf32> -> vector<8x640xf32>
    %210 = arith.addf %205, %209 : vector<8x640xf32>
    %c7_215 = arith.constant 7 : index
    %c0_216 = arith.constant 0 : index
    %c0_217 = arith.constant 0 : index
    %211 = vector.load %arg5[%c7_215, %c0_216, %c0_217] : memref<9x8x8xf32, #tpu.memory_space<vmem>>, vector<1x8x8xf32>
    %212 = vector.shape_cast %211 : vector<1x8x8xf32> to vector<8x8xf32>
    %c0_218 = arith.constant 0 : index
    %c146_219 = arith.constant 146 : index
    %213 = vector.load %arg10[%c0_218, %c146_219] : memref<8x896xf32, #tpu.memory_space<vmem>>, vector<8x640xf32>
    %cst_220 = arith.constant dense<0.000000e+00> : vector<8x640xf32>
    %214 = tpu.matmul %212, %213, %cst_220 {dimension_numbers = #tpu.dot_dimension_numbers<[1], [0], [0], [1], [0, 0, 1, 1], [], []>} : vector<8x8xf32>, vector<8x640xf32>, vector<8x640xf32> -> vector<8x640xf32>
    %215 = arith.addf %210, %214 : vector<8x640xf32>
    %c8_221 = arith.constant 8 : index
    %c0_222 = arith.constant 0 : index
    %c0_223 = arith.constant 0 : index
    %216 = vector.load %arg5[%c8_221, %c0_222, %c0_223] : memref<9x8x8xf32, #tpu.memory_space<vmem>>, vector<1x8x8xf32>
    %217 = vector.shape_cast %216 : vector<1x8x8xf32> to vector<8x8xf32>
    %c0_224 = arith.constant 0 : index
    %c147_225 = arith.constant 147 : index
    %218 = vector.load %arg10[%c0_224, %c147_225] : memref<8x896xf32, #tpu.memory_space<vmem>>, vector<8x640xf32>
    %cst_226 = arith.constant dense<0.000000e+00> : vector<8x640xf32>
    %219 = tpu.matmul %217, %218, %cst_226 {dimension_numbers = #tpu.dot_dimension_numbers<[1], [0], [0], [1], [0, 0, 1, 1], [], []>} : vector<8x8xf32>, vector<8x640xf32>, vector<8x640xf32> -> vector<8x640xf32>
    %220 = arith.addf %215, %219 : vector<8x640xf32>
    %221 = vector.broadcast %0 : vector<1x640xf32> to vector<8x640xf32>
    %222 = arith.mulf %220, %221 : vector<8x640xf32>
    %cst_227 = arith.constant dense<0.000000e+00> : vector<8xf32>
    %223 = vector.multi_reduction <add>, %222, %cst_227 [1] : vector<8x640xf32> to vector<8xf32>
    %224 = vector.shape_cast %223 : vector<8xf32> to vector<8x1xf32>
    %225 = arith.mulf %222, %220 : vector<8x640xf32>
    %cst_228 = arith.constant dense<0.000000e+00> : vector<8xf32>
    %226 = vector.multi_reduction <add>, %225, %cst_228 [1] : vector<8x640xf32> to vector<8xf32>
    %227 = vector.shape_cast %226 : vector<8xf32> to vector<8x1xf32>
    %cst_229 = arith.constant 5.120000e+02 : f32
    %228 = vector.broadcast %cst_229 : f32 to vector<8x1xf32>
    %229 = arith.divf %224, %228 : vector<8x1xf32>
    %cst_230 = arith.constant 5.120000e+02 : f32
    %230 = vector.broadcast %cst_230 : f32 to vector<8x1xf32>
    %231 = arith.divf %227, %230 : vector<8x1xf32>
    %232 = arith.mulf %229, %229 : vector<8x1xf32>
    %233 = arith.subf %231, %232 : vector<8x1xf32>
    %c0_231 = arith.constant 0 : index
    %c0_232 = arith.constant 0 : index
    %234 = vector.load %arg6[%c0_231, %c0_232] : memref<8x1xf32, #tpu.memory_space<vmem>>, vector<8x1xf32>
    %cst_233 = arith.constant 9.99999974E-6 : f32
    %235 = vector.broadcast %cst_233 : f32 to vector<8x1xf32>
    %236 = arith.addf %233, %235 : vector<8x1xf32>
    %237 = math.rsqrt %236 : vector<8x1xf32>
    %238 = arith.mulf %234, %237 : vector<8x1xf32>
    %c0_234 = arith.constant 0 : index
    %c0_235 = arith.constant 0 : index
    %239 = vector.load %arg7[%c0_234, %c0_235] : memref<8x1xf32, #tpu.memory_space<vmem>>, vector<8x1xf32>
    %240 = arith.mulf %229, %238 : vector<8x1xf32>
    %241 = arith.subf %239, %240 : vector<8x1xf32>
    %242 = vector.broadcast %238 : vector<8x1xf32> to vector<8x640xf32>
    %243 = arith.mulf %220, %242 : vector<8x640xf32>
    %244 = vector.broadcast %241 : vector<8x1xf32> to vector<8x640xf32>
    %245 = arith.addf %243, %244 : vector<8x640xf32>
    %c0_236 = arith.constant 0 : index
    %c128_237 = arith.constant 128 : index
    %246 = vector.load %arg9[%c0_236, %c128_237] : memref<8x896xf32, #tpu.memory_space<vmem>>, vector<8x640xf32>
    %247 = arith.addf %245, %246 : vector<8x640xf32>
    %cst_238 = arith.constant 0.000000e+00 : f32
    %248 = vector.broadcast %cst_238 : f32 to vector<8x640xf32>
    %249 = arith.maximumf %247, %248 : vector<8x640xf32>
    %c0_239 = arith.constant 0 : index
    %c128_240 = arith.constant 128 : index
    %250 = vector.load %arg10[%c0_239, %c128_240] : memref<8x896xf32, #tpu.memory_space<vmem>>, vector<8x640xf32>
    tpu.vector_store %arg10[%c0_239, %c128_240], %249 {strides = array<i32>} : memref<8x896xf32, #tpu.memory_space<vmem>>, vector<8x640xf32>,
    %c0_241 = arith.constant 0 : index
    %c128_242 = arith.constant 128 : index
    %251 = vector.load %arg10[%c0_241, %c128_242] : memref<8x896xf32, #tpu.memory_space<vmem>>, vector<4x16xf32>
    %c0_243 = arith.constant 0 : index
    %c0_244 = arith.constant 0 : index
    %c0_245 = arith.constant 0 : index
    %252 = vector.load %arg8[%c0_243, %c0_244, %c0_245] : memref<2x4x256xf32, #tpu.memory_space<vmem>>, vector<1x4x16xf32>
    %253 = vector.shape_cast %252 : vector<1x4x16xf32> to vector<4x16xf32>
    %254 = vector.shape_cast %251 : vector<4x16xf32> to vector<1x4x16xf32>
    tpu.vector_store %arg8[%c0_243, %c0_244, %c0_245], %254 {strides = array<i32>} : memref<2x4x256xf32, #tpu.memory_space<vmem>>, vector<1x4x16xf32>,
    %c0_246 = arith.constant 0 : index
    %c146_247 = arith.constant 146 : index
    %255 = vector.load %arg10[%c0_246, %c146_247] : memref<8x896xf32, #tpu.memory_space<vmem>>, vector<4x16xf32>
    %c0_248 = arith.constant 0 : index
    %c0_249 = arith.constant 0 : index
    %c16_250 = arith.constant 16 : index
    %256 = vector.load %arg8[%c0_248, %c0_249, %c16_250] : memref<2x4x256xf32, #tpu.memory_space<vmem>>, vector<1x4x16xf32>
    %257 = vector.shape_cast %256 : vector<1x4x16xf32> to vector<4x16xf32>
    %258 = vector.shape_cast %255 : vector<4x16xf32> to vector<1x4x16xf32>
    tpu.vector_store %arg8[%c0_248, %c0_249, %c16_250], %258 {strides = array<i32>} : memref<2x4x256xf32, #tpu.memory_space<vmem>>, vector<1x4x16xf32>,
    %c0_251 = arith.constant 0 : index
    %c164_252 = arith.constant 164 : index
    %259 = vector.load %arg10[%c0_251, %c164_252] : memref<8x896xf32, #tpu.memory_space<vmem>>, vector<4x16xf32>
    %c0_253 = arith.constant 0 : index
    %c0_254 = arith.constant 0 : index
    %c32_255 = arith.constant 32 : index
    %260 = vector.load %arg8[%c0_253, %c0_254, %c32_255] : memref<2x4x256xf32, #tpu.memory_space<vmem>>, vector<1x4x16xf32>
    %261 = vector.shape_cast %260 : vector<1x4x16xf32> to vector<4x16xf32>
    %262 = vector.shape_cast %259 : vector<4x16xf32> to vector<1x4x16xf32>
    tpu.vector_store %arg8[%c0_253, %c0_254, %c32_255], %262 {strides = array<i32>} : memref<2x4x256xf32, #tpu.memory_space<vmem>>, vector<1x4x16xf32>,
    %c0_256 = arith.constant 0 : index
    %c182_257 = arith.constant 182 : index
    %263 = vector.load %arg10[%c0_256, %c182_257] : memref<8x896xf32, #tpu.memory_space<vmem>>, vector<4x16xf32>
    %c0_258 = arith.constant 0 : index
    %c0_259 = arith.constant 0 : index
    %c48_260 = arith.constant 48 : index
    %264 = vector.load %arg8[%c0_258, %c0_259, %c48_260] : memref<2x4x256xf32, #tpu.memory_space<vmem>>, vector<1x4x16xf32>
    %265 = vector.shape_cast %264 : vector<1x4x16xf32> to vector<4x16xf32>
    %266 = vector.shape_cast %263 : vector<4x16xf32> to vector<1x4x16xf32>
    tpu.vector_store %arg8[%c0_258, %c0_259, %c48_260], %266 {strides = array<i32>} : memref<2x4x256xf32, #tpu.memory_space<vmem>>, vector<1x4x16xf32>,
    %c0_261 = arith.constant 0 : index
    %c200_262 = arith.constant 200 : index
    %267 = vector.load %arg10[%c0_261, %c200_262] : memref<8x896xf32, #tpu.memory_space<vmem>>, vector<4x16xf32>
    %c0_263 = arith.constant 0 : index
    %c0_264 = arith.constant 0 : index
    %c64_265 = arith.constant 64 : index
    %268 = vector.load %arg8[%c0_263, %c0_264, %c64_265] : memref<2x4x256xf32, #tpu.memory_space<vmem>>, vector<1x4x16xf32>
    %269 = vector.shape_cast %268 : vector<1x4x16xf32> to vector<4x16xf32>
    %270 = vector.shape_cast %267 : vector<4x16xf32> to vector<1x4x16xf32>
    tpu.vector_store %arg8[%c0_263, %c0_264, %c64_265], %270 {strides = array<i32>} : memref<2x4x256xf32, #tpu.memory_space<vmem>>, vector<1x4x16xf32>,
    %c0_266 = arith.constant 0 : index
    %c218_267 = arith.constant 218 : index
    %271 = vector.load %arg10[%c0_266, %c218_267] : memref<8x896xf32, #tpu.memory_space<vmem>>, vector<4x16xf32>
    %c0_268 = arith.constant 0 : index
    %c0_269 = arith.constant 0 : index
    %c80_270 = arith.constant 80 : index
    %272 = vector.load %arg8[%c0_268, %c0_269, %c80_270] : memref<2x4x256xf32, #tpu.memory_space<vmem>>, vector<1x4x16xf32>
    %273 = vector.shape_cast %272 : vector<1x4x16xf32> to vector<4x16xf32>
    %274 = vector.shape_cast %271 : vector<4x16xf32> to vector<1x4x16xf32>
    tpu.vector_store %arg8[%c0_268, %c0_269, %c80_270], %274 {strides = array<i32>} : memref<2x4x256xf32, #tpu.memory_space<vmem>>, vector<1x4x16xf32>,
    %c0_271 = arith.constant 0 : index
    %c236_272 = arith.constant 236 : index
    %275 = vector.load %arg10[%c0_271, %c236_272] : memref<8x896xf32, #tpu.memory_space<vmem>>, vector<4x16xf32>
    %c0_273 = arith.constant 0 : index
    %c0_274 = arith.constant 0 : index
    %c96_275 = arith.constant 96 : index
    %276 = vector.load %arg8[%c0_273, %c0_274, %c96_275] : memref<2x4x256xf32, #tpu.memory_space<vmem>>, vector<1x4x16xf32>
    %277 = vector.shape_cast %276 : vector<1x4x16xf32> to vector<4x16xf32>
    %278 = vector.shape_cast %275 : vector<4x16xf32> to vector<1x4x16xf32>
    tpu.vector_store %arg8[%c0_273, %c0_274, %c96_275], %278 {strides = array<i32>} : memref<2x4x256xf32, #tpu.memory_space<vmem>>, vector<1x4x16xf32>,
    %c0_276 = arith.constant 0 : index
    %c254_277 = arith.constant 254 : index
    %279 = vector.load %arg10[%c0_276, %c254_277] : memref<8x896xf32, #tpu.memory_space<vmem>>, vector<4x16xf32>
    %c0_278 = arith.constant 0 : index
    %c0_279 = arith.constant 0 : index
    %c112_280 = arith.constant 112 : index
    %280 = vector.load %arg8[%c0_278, %c0_279, %c112_280] : memref<2x4x256xf32, #tpu.memory_space<vmem>>, vector<1x4x16xf32>
    %281 = vector.shape_cast %280 : vector<1x4x16xf32> to vector<4x16xf32>
    %282 = vector.shape_cast %279 : vector<4x16xf32> to vector<1x4x16xf32>
    tpu.vector_store %arg8[%c0_278, %c0_279, %c112_280], %282 {strides = array<i32>} : memref<2x4x256xf32, #tpu.memory_space<vmem>>, vector<1x4x16xf32>,
    %c0_281 = arith.constant 0 : index
    %c272_282 = arith.constant 272 : index
    %283 = vector.load %arg10[%c0_281, %c272_282] : memref<8x896xf32, #tpu.memory_space<vmem>>, vector<4x16xf32>
    %c0_283 = arith.constant 0 : index
    %c0_284 = arith.constant 0 : index
    %c128_285 = arith.constant 128 : index
    %284 = vector.load %arg8[%c0_283, %c0_284, %c128_285] : memref<2x4x256xf32, #tpu.memory_space<vmem>>, vector<1x4x16xf32>
    %285 = vector.shape_cast %284 : vector<1x4x16xf32> to vector<4x16xf32>
    %286 = vector.shape_cast %283 : vector<4x16xf32> to vector<1x4x16xf32>
    tpu.vector_store %arg8[%c0_283, %c0_284, %c128_285], %286 {strides = array<i32>} : memref<2x4x256xf32, #tpu.memory_space<vmem>>, vector<1x4x16xf32>,
    %c0_286 = arith.constant 0 : index
    %c290_287 = arith.constant 290 : index
    %287 = vector.load %arg10[%c0_286, %c290_287] : memref<8x896xf32, #tpu.memory_space<vmem>>, vector<4x16xf32>
    %c0_288 = arith.constant 0 : index
    %c0_289 = arith.constant 0 : index
    %c144_290 = arith.constant 144 : index
    %288 = vector.load %arg8[%c0_288, %c0_289, %c144_290] : memref<2x4x256xf32, #tpu.memory_space<vmem>>, vector<1x4x16xf32>
    %289 = vector.shape_cast %288 : vector<1x4x16xf32> to vector<4x16xf32>
    %290 = vector.shape_cast %287 : vector<4x16xf32> to vector<1x4x16xf32>
    tpu.vector_store %arg8[%c0_288, %c0_289, %c144_290], %290 {strides = array<i32>} : memref<2x4x256xf32, #tpu.memory_space<vmem>>, vector<1x4x16xf32>,
    %c0_291 = arith.constant 0 : index
    %c308_292 = arith.constant 308 : index
    %291 = vector.load %arg10[%c0_291, %c308_292] : memref<8x896xf32, #tpu.memory_space<vmem>>, vector<4x16xf32>
    %c0_293 = arith.constant 0 : index
    %c0_294 = arith.constant 0 : index
    %c160_295 = arith.constant 160 : index
    %292 = vector.load %arg8[%c0_293, %c0_294, %c160_295] : memref<2x4x256xf32, #tpu.memory_space<vmem>>, vector<1x4x16xf32>
    %293 = vector.shape_cast %292 : vector<1x4x16xf32> to vector<4x16xf32>
    %294 = vector.shape_cast %291 : vector<4x16xf32> to vector<1x4x16xf32>
    tpu.vector_store %arg8[%c0_293, %c0_294, %c160_295], %294 {strides = array<i32>} : memref<2x4x256xf32, #tpu.memory_space<vmem>>, vector<1x4x16xf32>,
    %c0_296 = arith.constant 0 : index
    %c326_297 = arith.constant 326 : index
    %295 = vector.load %arg10[%c0_296, %c326_297] : memref<8x896xf32, #tpu.memory_space<vmem>>, vector<4x16xf32>
    %c0_298 = arith.constant 0 : index
    %c0_299 = arith.constant 0 : index
    %c176_300 = arith.constant 176 : index
    %296 = vector.load %arg8[%c0_298, %c0_299, %c176_300] : memref<2x4x256xf32, #tpu.memory_space<vmem>>, vector<1x4x16xf32>
    %297 = vector.shape_cast %296 : vector<1x4x16xf32> to vector<4x16xf32>
    %298 = vector.shape_cast %295 : vector<4x16xf32> to vector<1x4x16xf32>
    tpu.vector_store %arg8[%c0_298, %c0_299, %c176_300], %298 {strides = array<i32>} : memref<2x4x256xf32, #tpu.memory_space<vmem>>, vector<1x4x16xf32>,
    %c0_301 = arith.constant 0 : index
    %c344_302 = arith.constant 344 : index
    %299 = vector.load %arg10[%c0_301, %c344_302] : memref<8x896xf32, #tpu.memory_space<vmem>>, vector<4x16xf32>
    %c0_303 = arith.constant 0 : index
    %c0_304 = arith.constant 0 : index
    %c192_305 = arith.constant 192 : index
    %300 = vector.load %arg8[%c0_303, %c0_304, %c192_305] : memref<2x4x256xf32, #tpu.memory_space<vmem>>, vector<1x4x16xf32>
    %301 = vector.shape_cast %300 : vector<1x4x16xf32> to vector<4x16xf32>
    %302 = vector.shape_cast %299 : vector<4x16xf32> to vector<1x4x16xf32>
    tpu.vector_store %arg8[%c0_303, %c0_304, %c192_305], %302 {strides = array<i32>} : memref<2x4x256xf32, #tpu.memory_space<vmem>>, vector<1x4x16xf32>,
    %c0_306 = arith.constant 0 : index
    %c362_307 = arith.constant 362 : index
    %303 = vector.load %arg10[%c0_306, %c362_307] : memref<8x896xf32, #tpu.memory_space<vmem>>, vector<4x16xf32>
    %c0_308 = arith.constant 0 : index
    %c0_309 = arith.constant 0 : index
    %c208_310 = arith.constant 208 : index
    %304 = vector.load %arg8[%c0_308, %c0_309, %c208_310] : memref<2x4x256xf32, #tpu.memory_space<vmem>>, vector<1x4x16xf32>
    %305 = vector.shape_cast %304 : vector<1x4x16xf32> to vector<4x16xf32>
    %306 = vector.shape_cast %303 : vector<4x16xf32> to vector<1x4x16xf32>
    tpu.vector_store %arg8[%c0_308, %c0_309, %c208_310], %306 {strides = array<i32>} : memref<2x4x256xf32, #tpu.memory_space<vmem>>, vector<1x4x16xf32>,
    %c0_311 = arith.constant 0 : index
    %c380_312 = arith.constant 380 : index
    %307 = vector.load %arg10[%c0_311, %c380_312] : memref<8x896xf32, #tpu.memory_space<vmem>>, vector<4x16xf32>
    %c0_313 = arith.constant 0 : index
    %c0_314 = arith.constant 0 : index
    %c224_315 = arith.constant 224 : index
    %308 = vector.load %arg8[%c0_313, %c0_314, %c224_315] : memref<2x4x256xf32, #tpu.memory_space<vmem>>, vector<1x4x16xf32>
    %309 = vector.shape_cast %308 : vector<1x4x16xf32> to vector<4x16xf32>
    %310 = vector.shape_cast %307 : vector<4x16xf32> to vector<1x4x16xf32>
    tpu.vector_store %arg8[%c0_313, %c0_314, %c224_315], %310 {strides = array<i32>} : memref<2x4x256xf32, #tpu.memory_space<vmem>>, vector<1x4x16xf32>,
    %c0_316 = arith.constant 0 : index
    %c398_317 = arith.constant 398 : index
    %311 = vector.load %arg10[%c0_316, %c398_317] : memref<8x896xf32, #tpu.memory_space<vmem>>, vector<4x16xf32>
    %c0_318 = arith.constant 0 : index
    %c0_319 = arith.constant 0 : index
    %c240_320 = arith.constant 240 : index
    %312 = vector.load %arg8[%c0_318, %c0_319, %c240_320] : memref<2x4x256xf32, #tpu.memory_space<vmem>>, vector<1x4x16xf32>
    %313 = vector.shape_cast %312 : vector<1x4x16xf32> to vector<4x16xf32>
    %314 = vector.shape_cast %311 : vector<4x16xf32> to vector<1x4x16xf32>
    tpu.vector_store %arg8[%c0_318, %c0_319, %c240_320], %314 {strides = array<i32>} : memref<2x4x256xf32, #tpu.memory_space<vmem>>, vector<1x4x16xf32>,
    %c0_321 = arith.constant 0 : index
    %c452_322 = arith.constant 452 : index
    %315 = vector.load %arg10[%c0_321, %c452_322] : memref<8x896xf32, #tpu.memory_space<vmem>>, vector<4x16xf32>
    %c1_323 = arith.constant 1 : index
    %c0_324 = arith.constant 0 : index
    %c0_325 = arith.constant 0 : index
    %316 = vector.load %arg8[%c1_323, %c0_324, %c0_325] : memref<2x4x256xf32, #tpu.memory_space<vmem>>, vector<1x4x16xf32>
    %317 = vector.shape_cast %316 : vector<1x4x16xf32> to vector<4x16xf32>
    %318 = vector.shape_cast %315 : vector<4x16xf32> to vector<1x4x16xf32>
    tpu.vector_store %arg8[%c1_323, %c0_324, %c0_325], %318 {strides = array<i32>} : memref<2x4x256xf32, #tpu.memory_space<vmem>>, vector<1x4x16xf32>,
    %c0_326 = arith.constant 0 : index
    %c470_327 = arith.constant 470 : index
    %319 = vector.load %arg10[%c0_326, %c470_327] : memref<8x896xf32, #tpu.memory_space<vmem>>, vector<4x16xf32>
    %c1_328 = arith.constant 1 : index
    %c0_329 = arith.constant 0 : index
    %c16_330 = arith.constant 16 : index
    %320 = vector.load %arg8[%c1_328, %c0_329, %c16_330] : memref<2x4x256xf32, #tpu.memory_space<vmem>>, vector<1x4x16xf32>
    %321 = vector.shape_cast %320 : vector<1x4x16xf32> to vector<4x16xf32>
    %322 = vector.shape_cast %319 : vector<4x16xf32> to vector<1x4x16xf32>
    tpu.vector_store %arg8[%c1_328, %c0_329, %c16_330], %322 {strides = array<i32>} : memref<2x4x256xf32, #tpu.memory_space<vmem>>, vector<1x4x16xf32>,
    %c0_331 = arith.constant 0 : index
    %c488_332 = arith.constant 488 : index
    %323 = vector.load %arg10[%c0_331, %c488_332] : memref<8x896xf32, #tpu.memory_space<vmem>>, vector<4x16xf32>
    %c1_333 = arith.constant 1 : index
    %c0_334 = arith.constant 0 : index
    %c32_335 = arith.constant 32 : index
    %324 = vector.load %arg8[%c1_333, %c0_334, %c32_335] : memref<2x4x256xf32, #tpu.memory_space<vmem>>, vector<1x4x16xf32>
    %325 = vector.shape_cast %324 : vector<1x4x16xf32> to vector<4x16xf32>
    %326 = vector.shape_cast %323 : vector<4x16xf32> to vector<1x4x16xf32>
    tpu.vector_store %arg8[%c1_333, %c0_334, %c32_335], %326 {strides = array<i32>} : memref<2x4x256xf32, #tpu.memory_space<vmem>>, vector<1x4x16xf32>,
    %c0_336 = arith.constant 0 : index
    %c506_337 = arith.constant 506 : index
    %327 = vector.load %arg10[%c0_336, %c506_337] : memref<8x896xf32, #tpu.memory_space<vmem>>, vector<4x16xf32>
    %c1_338 = arith.constant 1 : index
    %c0_339 = arith.constant 0 : index
    %c48_340 = arith.constant 48 : index
    %328 = vector.load %arg8[%c1_338, %c0_339, %c48_340] : memref<2x4x256xf32, #tpu.memory_space<vmem>>, vector<1x4x16xf32>
    %329 = vector.shape_cast %328 : vector<1x4x16xf32> to vector<4x16xf32>
    %330 = vector.shape_cast %327 : vector<4x16xf32> to vector<1x4x16xf32>
    tpu.vector_store %arg8[%c1_338, %c0_339, %c48_340], %330 {strides = array<i32>} : memref<2x4x256xf32, #tpu.memory_space<vmem>>, vector<1x4x16xf32>,
    %c0_341 = arith.constant 0 : index
    %c524_342 = arith.constant 524 : index
    %331 = vector.load %arg10[%c0_341, %c524_342] : memref<8x896xf32, #tpu.memory_space<vmem>>, vector<4x16xf32>
    %c1_343 = arith.constant 1 : index
    %c0_344 = arith.constant 0 : index
    %c64_345 = arith.constant 64 : index
    %332 = vector.load %arg8[%c1_343, %c0_344, %c64_345] : memref<2x4x256xf32, #tpu.memory_space<vmem>>, vector<1x4x16xf32>
    %333 = vector.shape_cast %332 : vector<1x4x16xf32> to vector<4x16xf32>
    %334 = vector.shape_cast %331 : vector<4x16xf32> to vector<1x4x16xf32>
    tpu.vector_store %arg8[%c1_343, %c0_344, %c64_345], %334 {strides = array<i32>} : memref<2x4x256xf32, #tpu.memory_space<vmem>>, vector<1x4x16xf32>,
    %c0_346 = arith.constant 0 : index
    %c542_347 = arith.constant 542 : index
    %335 = vector.load %arg10[%c0_346, %c542_347] : memref<8x896xf32, #tpu.memory_space<vmem>>, vector<4x16xf32>
    %c1_348 = arith.constant 1 : index
    %c0_349 = arith.constant 0 : index
    %c80_350 = arith.constant 80 : index
    %336 = vector.load %arg8[%c1_348, %c0_349, %c80_350] : memref<2x4x256xf32, #tpu.memory_space<vmem>>, vector<1x4x16xf32>
    %337 = vector.shape_cast %336 : vector<1x4x16xf32> to vector<4x16xf32>
    %338 = vector.shape_cast %335 : vector<4x16xf32> to vector<1x4x16xf32>
    tpu.vector_store %arg8[%c1_348, %c0_349, %c80_350], %338 {strides = array<i32>} : memref<2x4x256xf32, #tpu.memory_space<vmem>>, vector<1x4x16xf32>,
    %c0_351 = arith.constant 0 : index
    %c560_352 = arith.constant 560 : index
    %339 = vector.load %arg10[%c0_351, %c560_352] : memref<8x896xf32, #tpu.memory_space<vmem>>, vector<4x16xf32>
    %c1_353 = arith.constant 1 : index
    %c0_354 = arith.constant 0 : index
    %c96_355 = arith.constant 96 : index
    %340 = vector.load %arg8[%c1_353, %c0_354, %c96_355] : memref<2x4x256xf32, #tpu.memory_space<vmem>>, vector<1x4x16xf32>
    %341 = vector.shape_cast %340 : vector<1x4x16xf32> to vector<4x16xf32>
    %342 = vector.shape_cast %339 : vector<4x16xf32> to vector<1x4x16xf32>
    tpu.vector_store %arg8[%c1_353, %c0_354, %c96_355], %342 {strides = array<i32>} : memref<2x4x256xf32, #tpu.memory_space<vmem>>, vector<1x4x16xf32>,
    %c0_356 = arith.constant 0 : index
    %c578_357 = arith.constant 578 : index
    %343 = vector.load %arg10[%c0_356, %c578_357] : memref<8x896xf32, #tpu.memory_space<vmem>>, vector<4x16xf32>
    %c1_358 = arith.constant 1 : index
    %c0_359 = arith.constant 0 : index
    %c112_360 = arith.constant 112 : index
    %344 = vector.load %arg8[%c1_358, %c0_359, %c112_360] : memref<2x4x256xf32, #tpu.memory_space<vmem>>, vector<1x4x16xf32>
    %345 = vector.shape_cast %344 : vector<1x4x16xf32> to vector<4x16xf32>
    %346 = vector.shape_cast %343 : vector<4x16xf32> to vector<1x4x16xf32>
    tpu.vector_store %arg8[%c1_358, %c0_359, %c112_360], %346 {strides = array<i32>} : memref<2x4x256xf32, #tpu.memory_space<vmem>>, vector<1x4x16xf32>,
    %c0_361 = arith.constant 0 : index
    %c596_362 = arith.constant 596 : index
    %347 = vector.load %arg10[%c0_361, %c596_362] : memref<8x896xf32, #tpu.memory_space<vmem>>, vector<4x16xf32>
    %c1_363 = arith.constant 1 : index
    %c0_364 = arith.constant 0 : index
    %c128_365 = arith.constant 128 : index
    %348 = vector.load %arg8[%c1_363, %c0_364, %c128_365] : memref<2x4x256xf32, #tpu.memory_space<vmem>>, vector<1x4x16xf32>
    %349 = vector.shape_cast %348 : vector<1x4x16xf32> to vector<4x16xf32>
    %350 = vector.shape_cast %347 : vector<4x16xf32> to vector<1x4x16xf32>
    tpu.vector_store %arg8[%c1_363, %c0_364, %c128_365], %350 {strides = array<i32>} : memref<2x4x256xf32, #tpu.memory_space<vmem>>, vector<1x4x16xf32>,
    %c0_366 = arith.constant 0 : index
    %c614_367 = arith.constant 614 : index
    %351 = vector.load %arg10[%c0_366, %c614_367] : memref<8x896xf32, #tpu.memory_space<vmem>>, vector<4x16xf32>
    %c1_368 = arith.constant 1 : index
    %c0_369 = arith.constant 0 : index
    %c144_370 = arith.constant 144 : index
    %352 = vector.load %arg8[%c1_368, %c0_369, %c144_370] : memref<2x4x256xf32, #tpu.memory_space<vmem>>, vector<1x4x16xf32>
    %353 = vector.shape_cast %352 : vector<1x4x16xf32> to vector<4x16xf32>
    %354 = vector.shape_cast %351 : vector<4x16xf32> to vector<1x4x16xf32>
    tpu.vector_store %arg8[%c1_368, %c0_369, %c144_370], %354 {strides = array<i32>} : memref<2x4x256xf32, #tpu.memory_space<vmem>>, vector<1x4x16xf32>,
    %c0_371 = arith.constant 0 : index
    %c632_372 = arith.constant 632 : index
    %355 = vector.load %arg10[%c0_371, %c632_372] : memref<8x896xf32, #tpu.memory_space<vmem>>, vector<4x16xf32>
    %c1_373 = arith.constant 1 : index
    %c0_374 = arith.constant 0 : index
    %c160_375 = arith.constant 160 : index
    %356 = vector.load %arg8[%c1_373, %c0_374, %c160_375] : memref<2x4x256xf32, #tpu.memory_space<vmem>>, vector<1x4x16xf32>
    %357 = vector.shape_cast %356 : vector<1x4x16xf32> to vector<4x16xf32>
    %358 = vector.shape_cast %355 : vector<4x16xf32> to vector<1x4x16xf32>
    tpu.vector_store %arg8[%c1_373, %c0_374, %c160_375], %358 {strides = array<i32>} : memref<2x4x256xf32, #tpu.memory_space<vmem>>, vector<1x4x16xf32>,
    %c0_376 = arith.constant 0 : index
    %c650_377 = arith.constant 650 : index
    %359 = vector.load %arg10[%c0_376, %c650_377] : memref<8x896xf32, #tpu.memory_space<vmem>>, vector<4x16xf32>
    %c1_378 = arith.constant 1 : index
    %c0_379 = arith.constant 0 : index
    %c176_380 = arith.constant 176 : index
    %360 = vector.load %arg8[%c1_378, %c0_379, %c176_380] : memref<2x4x256xf32, #tpu.memory_space<vmem>>, vector<1x4x16xf32>
    %361 = vector.shape_cast %360 : vector<1x4x16xf32> to vector<4x16xf32>
    %362 = vector.shape_cast %359 : vector<4x16xf32> to vector<1x4x16xf32>
    tpu.vector_store %arg8[%c1_378, %c0_379, %c176_380], %362 {strides = array<i32>} : memref<2x4x256xf32, #tpu.memory_space<vmem>>, vector<1x4x16xf32>,
    %c0_381 = arith.constant 0 : index
    %c668_382 = arith.constant 668 : index
    %363 = vector.load %arg10[%c0_381, %c668_382] : memref<8x896xf32, #tpu.memory_space<vmem>>, vector<4x16xf32>
    %c1_383 = arith.constant 1 : index
    %c0_384 = arith.constant 0 : index
    %c192_385 = arith.constant 192 : index
    %364 = vector.load %arg8[%c1_383, %c0_384, %c192_385] : memref<2x4x256xf32, #tpu.memory_space<vmem>>, vector<1x4x16xf32>
    %365 = vector.shape_cast %364 : vector<1x4x16xf32> to vector<4x16xf32>
    %366 = vector.shape_cast %363 : vector<4x16xf32> to vector<1x4x16xf32>
    tpu.vector_store %arg8[%c1_383, %c0_384, %c192_385], %366 {strides = array<i32>} : memref<2x4x256xf32, #tpu.memory_space<vmem>>, vector<1x4x16xf32>,
    %c0_386 = arith.constant 0 : index
    %c686_387 = arith.constant 686 : index
    %367 = vector.load %arg10[%c0_386, %c686_387] : memref<8x896xf32, #tpu.memory_space<vmem>>, vector<4x16xf32>
    %c1_388 = arith.constant 1 : index
    %c0_389 = arith.constant 0 : index
    %c208_390 = arith.constant 208 : index
    %368 = vector.load %arg8[%c1_388, %c0_389, %c208_390] : memref<2x4x256xf32, #tpu.memory_space<vmem>>, vector<1x4x16xf32>
    %369 = vector.shape_cast %368 : vector<1x4x16xf32> to vector<4x16xf32>
    %370 = vector.shape_cast %367 : vector<4x16xf32> to vector<1x4x16xf32>
    tpu.vector_store %arg8[%c1_388, %c0_389, %c208_390], %370 {strides = array<i32>} : memref<2x4x256xf32, #tpu.memory_space<vmem>>, vector<1x4x16xf32>,
    %c0_391 = arith.constant 0 : index
    %c704_392 = arith.constant 704 : index
    %371 = vector.load %arg10[%c0_391, %c704_392] : memref<8x896xf32, #tpu.memory_space<vmem>>, vector<4x16xf32>
    %c1_393 = arith.constant 1 : index
    %c0_394 = arith.constant 0 : index
    %c224_395 = arith.constant 224 : index
    %372 = vector.load %arg8[%c1_393, %c0_394, %c224_395] : memref<2x4x256xf32, #tpu.memory_space<vmem>>, vector<1x4x16xf32>
    %373 = vector.shape_cast %372 : vector<1x4x16xf32> to vector<4x16xf32>
    %374 = vector.shape_cast %371 : vector<4x16xf32> to vector<1x4x16xf32>
    tpu.vector_store %arg8[%c1_393, %c0_394, %c224_395], %374 {strides = array<i32>} : memref<2x4x256xf32, #tpu.memory_space<vmem>>, vector<1x4x16xf32>,
    %c0_396 = arith.constant 0 : index
    %c722_397 = arith.constant 722 : index
    %375 = vector.load %arg10[%c0_396, %c722_397] : memref<8x896xf32, #tpu.memory_space<vmem>>, vector<4x16xf32>
    %c1_398 = arith.constant 1 : index
    %c0_399 = arith.constant 0 : index
    %c240_400 = arith.constant 240 : index
    %376 = vector.load %arg8[%c1_398, %c0_399, %c240_400] : memref<2x4x256xf32, #tpu.memory_space<vmem>>, vector<1x4x16xf32>
    %377 = vector.shape_cast %376 : vector<1x4x16xf32> to vector<4x16xf32>
    %378 = vector.shape_cast %375 : vector<4x16xf32> to vector<1x4x16xf32>
    tpu.vector_store %arg8[%c1_398, %c0_399, %c240_400], %378 {strides = array<i32>} : memref<2x4x256xf32, #tpu.memory_space<vmem>>, vector<1x4x16xf32>,
    return
  }
}

</mosaic_0001>

<bundles_post_ra>
// kernel: residual_block.1
= control target key start
LH: loop header
LB: loop body
LE: loop exit
PB: predicated region body
PF: predicated region fallthrough
CT: control target
= control target key end

     0   :  { %v5444_v2 = vmov 0.0   ;;  %s5445_s9 = smov 16   ;;  %s5446_s10 = smov 14   ;;  %vm38_vm0 = vcmask 125952   ;;  %vm89_vm1 = vcmask 109568   ;;  %vm96_vm2 = vcmask 257152   ;;  %s6340_s0 = inlined_call_operand.vmem [shape: f32[2,4,256], index: 0, kind: input, shape index: {}]   ;;  %s6341_s2 = inlined_call_operand.vmem [shape: f32[9,8,8], index: 2, kind: input, shape index: {}]   ;;  %s6342_s1 = inlined_call_operand.vmem [shape: f32[1,640], index: 1, kind: input, shape index: {}]   ;;  %s6343_s3 = inlined_call_operand.vmem [shape: f32[8,1], index: 3, kind: input, shape index: {}]   ;;  %s6344_s4 = inlined_call_operand.vmem [shape: f32[8,1], index: 4, kind: input, shape index: {}]   ;;  %s6345_s5 = inlined_call_operand.vmem [shape: f32[9,8,8], index: 5, kind: input, shape index: {}]   ;;  %s6346_s6 = inlined_call_operand.vmem [shape: f32[8,1], index: 6, kind: input, shape index: {}]   ;;  %s6347_s7 = inlined_call_operand.vmem [shape: f32[8,1], index: 7, kind: input, shape index: {}]   ;;  %s6348_s8 = inlined_call_operand.vmem [shape: f32[2,4,256], index: 8, kind: output, shape index: {}]  }
   0x1   :  { %v91_v0 = vld [vmem:[%s6340_s0 + $0x4] sm:$0xf]  ;;  %v82_v1 = vld [vmem:[%s6340_s0] sm:$0xf]  ;;  %32 = vst [vmem:[#allocation2 + $0x10] sm:$0xff] %v5444_v2  ;;  %30 = vst [vmem:[#allocation2] sm:$0xff] %v5444_v2  ;;  %372 = vmatprep.mubr.f32.mxu0 %v5444_v2  ;;  %2663 = vmatprep.mubr.f32.mxu1 %v5444_v2 }
   0x2   :  { %31 = vst [vmem:[#allocation2 + $0x8] sm:$0xff] %v5444_v2  ;;  %33 = vst [vmem:[#allocation2 + $0x18] sm:$0xff] %v5444_v2  ;;  %93 = vrot.lane.b32.xlu1 %v91_v0, %s5445_s9  ;;  %84 = vrot.lane.b32.xlu0 %v82_v1, %s5446_s10  ;;  %v47_v3 = vld [vmem:[%s6340_s0] sm:$0xf]  ;;  %s5447_s15 = smov 4   ;;  %s5448_s16 = smov 2  }
   0x3   :  { %34 = vst [vmem:[#allocation2 + $0x20] sm:$0xff] %v5444_v2  ;;  %35 = vst [vmem:[#allocation2 + $0x28] sm:$0xff] %v5444_v2  ;;  %v40_v4 = vld [vmem:[%s6340_s0] sm:$0xf]  ;;  %v98_v6 = vld [vmem:[%s6340_s0 + $0x4] sm:$0xf] }
   0x4   :  { %v54_v5 = vld [vmem:[%s6340_s0] sm:$0xf]  ;;  %s5449_s21 = smov 6   ;;  %s5450_s22 = smov 18   ;;  %v105_v8 = vld [vmem:[%s6340_s0 + $0x4] sm:$0xf] }
   0x5   :  { %v61_v7 = vld [vmem:[%s6340_s0] sm:$0xf]  ;;  %s5451_s27 = smov 8   ;;  %s5452_s28 = smov 20   ;;  %v5043_v9 = vld [vmem:[%s6340_s0 + $0x8] sm:$0xf] }
   0x6   :  { %49 = vrot.lane.b32.xlu1 %v47_v3, %s5447_s15  ;;  %42 = vrot.lane.b32.xlu0 %v40_v4, %s5448_s16  ;;  %v112_v10 = vld [vmem:[%s6340_s0 + $0x4] sm:$0xf]  ;;  %v37_v11 = vld [vmem:[%s6340_s0] sm:$0xf]  ;;  %s5453_s13 = smov 74   ;;  %s5454_s14 = smov 22  }
   0x7   :  { %39 = vst.msk [vmem:[#allocation2 + $0x8] sm:$0xf] %vm38_vm0, %v37_v11  ;;  %v119_v12 = vld [vmem:[%s6340_s0 + $0x4] sm:$0xf]  ;;  %v68_v13 = vld [vmem:[%s6340_s0] sm:$0xf] }
   0x8   :  { %s5455_s19 = smov 24   ;;  %s5456_s20 = smov 10   ;;  %v75_v14 = vld [vmem:[%s6340_s0] sm:$0xf]  ;;  %v5044_v15 = vld [vmem:[%s6340_s0 + $0x8] sm:$0xf] }
   0x9   :  { %s5457_s26 = smov 12   ;;  %v133_v16 = vld [vmem:[%s6340_s0 + $0x4] sm:$0xf]  ;;  %s5459_s10 = smov 28   ;;  %v5045_v19 = vld [vmem:[%s6340_s0 + $0x8] sm:$0xf] }
   0xa   :  { %56 = vrot.lane.b32.xlu1 %v54_v5, %s5449_s21  ;;  %100 = vrot.lane.b32.xlu0 %v98_v6, %s5450_s22  ;;  %v126_v17 = vld [vmem:[%s6340_s0 + $0x4] sm:$0xf]  ;;  %s5460_s11 = smov 26   ;;  %s5461_s16 = smov 30   ;;  %v5040_v20 = vld [vmem:[%s6340_s0 + $0x8] sm:$0xf] }
   0xb   :  { %v142_v18 = vld [vmem:[%s6340_s0 + $0x4] sm:$0xf]  ;;  %s5462_s17 = smov 78   ;;  %v5046_v21 = vld [vmem:[%s6340_s0 + $0x8] sm:$0xf]  ;;  %s5463_s23 = smov 68  }
   0xc   :  { %s5464_s24 = smov 80   ;;  %v5041_v22 = vld [vmem:[%s6340_s0 + $0x8] sm:$0xf]  ;;  %s5465_s29 = smov 70   ;;  %v5048_v25 = vld [vmem:[%s6340_s0 + $0xc] sm:$0xf] }
   0xd   :  { %v5047_v23 = vld [vmem:[%s6340_s0 + $0x8] sm:$0xf]  ;;  %s5466_s30 = smov 82   ;;  %v5049_v26 = vld [vmem:[%s6340_s0 + $0xc] sm:$0xf]  ;;  %s5470_s21 = smov 88  }
   0xe   :  { %63 = vrot.lane.b32.xlu1 %v61_v7, %s5451_s27  ;;  %107 = vrot.lane.b32.xlu0 %v105_v8, %s5452_s28  ;;  %s5458_s27 = smov 76   ;;  %v5042_v24 = vld [vmem:[%s6340_s0 + $0x8] sm:$0xf]  ;;  %v5050_v27 = vld [vmem:[%s6340_s0 + $0xc] sm:$0xf]  ;;  %s5472_s28 = smov 92  }
   0xf   :  { %v5051_v28 = vld [vmem:[%s6340_s0 + $0xc] sm:$0xf]  ;;  %s5474_s12 = smov 96   ;;  %s5475_s15 = smov 98   ;;  %vm45_vm3 = vcmask 273552   ;;  %vm52_vm4 = vcmask 421152  }
  0x10   :  { %v5052_v29 = vld [vmem:[%s6340_s0 + $0xc] sm:$0xf]  ;;  %vm59_vm5 = vcmask 568752   ;;  %vm103_vm6 = vcmask 404752   ;;  %vm66_vm7 = vcmask 716352   ;;  %vm110_vm8 = vcmask 552352  }
  0x11   :  { %v5053_v30 = vld [vmem:[%s6340_s0 + $0xc] sm:$0xf]  ;;  %vm178_vm9 = vcmask 76800   ;;  %vm117_vm10 = vcmask 699952   ;;  %vm124_vm11 = vcmask 847552   ;;  %vm73_vm12 = vcmask 863952  }
  0x12   :  { %173 = vrot.lane.b32.xlu1 %v5043_v9, %s5453_s13  ;;  %114 = vrot.lane.b32.xlu0 %v112_v10, %s5454_s14  ;;  %s5467_s13 = smov 72   ;;  %s5468_s14 = smov 84   ;;  %v5054_v31 = vld [vmem:[%s6340_s0 + $0xc] sm:$0xf]  ;;  %vm80_vm13 = vcmask 1011552   ;;  %vm185_vm14 = vcmask 224352  }
  0x13   :  { %v5055_v32 = vld [vmem:[%s6340_s0 + $0xc] sm:$0xf]  ;;  %vm87_vm15 = vcmask 1044464   ;;  %s5476_s0 = smov 19   ;;  %s5478_s18 = smov 1  }
  0x14   :  { %v5056_v10 = vld [vmem:[%s6341_s2 + $0x8] sm:$0xff]  ;;  %s5488_s9 = smov 126   ;;  %s5503_s25 = smov 50  }
  0x16   :  { %121 = vrot.lane.b32.xlu1 %v119_v12, %s5455_s19  ;;  %70 = vrot.lane.b32.xlu0 %v68_v13, %s5456_s20  ;;  %s5469_s20 = smov 86   ;;  %s5479_s19 = smov 127  }
  0x1a   :  { %77 = vrot.lane.b32.xlu1 %v75_v14, %s5457_s26  ;;  %182 = vrot.lane.b32.xlu0 %v5044_v15, %s5458_s27  ;;  %s5471_s27 = smov 90   ;;  %s5504_s26 = smov 34  }
  0x1e   :  { %135 = vrot.lane.b32.xlu1 %v133_v16, %s5459_s10  ;;  %128 = vrot.lane.b32.xlu0 %v126_v17, %s5460_s11  ;;  %s5473_s11 = smov 94   ;;  %s5489_s10 = smov 58  }
  0x22   :  { %144 = vrot.lane.b32.xlu1 %v142_v18, %s5461_s16  ;;  %189 = vrot.lane.b32.xlu0 %v5045_v19, %s5462_s17  ;;  %s5477_s17 = smov 17  }
  0x26   :  { %152 = vrot.lane.b32.xlu1 %v5040_v20, %s5463_s23  ;;  %196 = vrot.lane.b32.xlu0 %v5046_v21, %s5464_s24  ;;  %s5482_s23 = smov 109   ;;  %s5502_s24 = smov 102  }
  0x2a   :  { %159 = vrot.lane.b32.xlu1 %v5041_v22, %s5465_s29  ;;  %203 = vrot.lane.b32.xlu0 %v5047_v23, %s5466_s30  ;;  %s5487_s30 = smov 44   ;;  %s5509_s29 = smov 40  }
  0x2e   :  { %166 = vrot.lane.b32.xlu1 %v5042_v24, %s5467_s13  ;;  %210 = vrot.lane.b32.xlu0 %v5048_v25, %s5468_s14  ;;  %v266_v24 = vld [vmem:[%s6341_s2] sm:$0xff]  ;;  %s5500_s13 = smov 36   ;;  %s5501_s14 = smov 118  }
  0x32   :  { %217 = vrot.lane.b32.xlu0 %v5049_v26, %s5469_s20  ;;  %224 = vrot.lane.b32.xlu1 %v5050_v27, %s5470_s21  ;;  %s5480_s20 = smov 111   ;;  %s5481_s21 = smov 110  }
  0x36   :  { %233 = vrot.lane.b32.xlu0 %v5051_v28, %s5471_s27  ;;  %240 = vrot.lane.b32.xlu1 %v5052_v29, %s5472_s28  ;;  %s5505_s27 = smov 116   ;;  %s5506_s28 = smov 48  }
  0x3a   :  { %247 = vrot.lane.b32.xlu0 %v5053_v30, %s5473_s11  ;;  %254 = vrot.lane.b32.xlu1 %v5054_v31, %s5474_s12  ;;  %s5498_s11 = smov 104   ;;  %s5499_s12 = smov 52  }
  0x3e   :  { %261 = vrot.lane.b32.xlu0 %v5055_v32, %s5475_s15  ;;  %281 = vrot.lane.b32.xlu1 %v5444_v2, %s5450_s22 }
  0x74   :  { %v94_v33 = vpop.permute.xlu1 %93  ;;  %v85_v34 = vpop.permute.xlu0 %84 }
  0x75   :  { %90 = vst.msk [vmem:[#allocation2 + $0x10] sm:$0xf] %vm89_vm1, %v85_v34  ;;  %vm140_vm1 = vcmask 93184  }
  0x76   :  { %97 = vst.msk [vmem:[#allocation2 + $0x10] sm:$0xf] %vm96_vm2, %v94_v33 }
  0x78   :  { %v50_v35 = vpop.permute.xlu1 %49  ;;  %v43_v36 = vpop.permute.xlu0 %42 }
  0x79   :  { %46 = vst.msk [vmem:[#allocation2 + $0x8] sm:$0xf] %vm45_vm3, %v43_v36  ;;  %vm131_vm3 = vcmask 995152   ;;  %v5063_v36 = vld [vmem:[%s6341_s2 + $0x10] sm:$0xff] }
  0x7a   :  { %53 = vst.msk [vmem:[#allocation2 + $0x8] sm:$0xf] %vm52_vm4, %v50_v35  ;;  %vm138_vm4 = vcmask 1044448  }
  0x7c   :  { %v57_v37 = vpop.permute.xlu1 %56  ;;  %v101_v38 = vpop.permute.xlu0 %100 }
  0x7d   :  { %60 = vst.msk [vmem:[#allocation2 + $0x8] sm:$0xf] %vm59_vm5, %v57_v37  ;;  %vm147_vm5 = vcmask 240752  }
  0x7e   :  { %104 = vst.msk [vmem:[#allocation2 + $0x10] sm:$0xf] %vm103_vm6, %v101_v38  ;;  %vm192_vm6 = vcmask 371952  }
  0x80   :  { %v64_v39 = vpop.permute.xlu1 %63  ;;  %v108_v40 = vpop.permute.xlu0 %107 }
  0x81   :  { %67 = vst.msk [vmem:[#allocation2 + $0x8] sm:$0xf] %vm66_vm7, %v64_v39  ;;  %vm155_vm7 = vcmask 683552  }
  0x82   :  { %111 = vst.msk [vmem:[#allocation2 + $0x10] sm:$0xf] %vm110_vm8, %v108_v40  ;;  %vm199_vm8 = vcmask 519552  }
  0x84   :  { %v174_v41 = vpop.permute.xlu1 %173  ;;  %v115_v42 = vpop.permute.xlu0 %114 }
  0x85   :  { %179 = vst.msk [vmem:[#allocation2 + $0x20] sm:$0xf] %vm178_vm9, %v174_v41  ;;  %vm162_vm9 = vcmask 831152  }
  0x86   :  { %118 = vst.msk [vmem:[#allocation2 + $0x10] sm:$0xf] %vm117_vm10, %v115_v42  ;;  %vm206_vm10 = vcmask 667152  }
  0x88   :  { %v122_v43 = vpop.permute.xlu1 %121  ;;  %v71_v44 = vpop.permute.xlu0 %70 }
  0x89   :  { %125 = vst.msk [vmem:[#allocation2 + $0x10] sm:$0xf] %vm124_vm11, %v122_v43  ;;  %vm169_vm11 = vcmask 978752  }
  0x8a   :  { %74 = vst.msk [vmem:[#allocation2 + $0x8] sm:$0xf] %vm73_vm12, %v71_v44  ;;  %vm213_vm12 = vcmask 814752  }
  0x8c   :  { %v78_v45 = vpop.permute.xlu1 %77  ;;  %v183_v46 = vpop.permute.xlu0 %182 }
  0x8d   :  { %81 = vst.msk [vmem:[#allocation2 + $0x8] sm:$0xf] %vm80_vm13, %v78_v45  ;;  %vm176_vm13 = vcmask 1044432  }
  0x8e   :  { %186 = vst.msk [vmem:[#allocation2 + $0x20] sm:$0xf] %vm185_vm14, %v183_v46  ;;  %vm220_vm14 = vcmask 962352  }
  0x8f   :  { %88 = vst.msk [vmem:[#allocation2 + $0x8] sm:$0xf] %vm87_vm15, %v85_v34  ;;  %vm229_vm15 = vcmask 60416  }
  0x90   :  { %v136_v47 = vpop.permute.xlu1 %135  ;;  %v129_v48 = vpop.permute.xlu0 %128 }
  0x91   :  { %141 = vst.msk [vmem:[#allocation2 + $0x18] sm:$0xf] %vm140_vm1, %v136_v47  ;;  %vm227_vm1 = vcmask 1044416  }
  0x92   :  { %132 = vst.msk [vmem:[#allocation2 + $0x10] sm:$0xf] %vm131_vm3, %v129_v48  ;;  %vm236_vm3 = vcmask 207952   ;;  %v5067_v48 = vld [vmem:[%s6341_s2 + $0x18] sm:$0xff] }
  0x93   :  { %139 = vst.msk [vmem:[#allocation2 + $0x10] sm:$0xf] %vm138_vm4, %v136_v47  ;;  %vm243_vm4 = vcmask 355552  }
  0x94   :  { %v145_v49 = vpop.permute.xlu1 %144  ;;  %v190_v50 = vpop.permute.xlu0 %189 }
  0x95   :  { %148 = vst.msk [vmem:[#allocation2 + $0x18] sm:$0xf] %vm147_vm5, %v145_v49  ;;  %vm250_vm5 = vcmask 503152  }
  0x96   :  { %193 = vst.msk [vmem:[#allocation2 + $0x20] sm:$0xf] %vm192_vm6, %v190_v50  ;;  %v5669_v51 = vld [vmem:[#allocation2 + $0x8] sm:$0xff]  ;;  %vm257_vm6 = vcmask 650752  }
  0x97   :  { %283 = vrot.lane.b32.xlu1 %v5669_v51, %s5450_s22 }
  0x98   :  { %v153_v52 = vpop.permute.xlu1 %152  ;;  %v197_v53 = vpop.permute.xlu0 %196 }
  0x99   :  { %156 = vst.msk [vmem:[#allocation2 + $0x18] sm:$0xf] %vm155_vm7, %v153_v52  ;;  %vm264_vm7 = vcmask 798352  }
  0x9a   :  { %200 = vst.msk [vmem:[#allocation2 + $0x20] sm:$0xf] %vm199_vm8, %v197_v53  ;;  %v5674_v54 = vld [vmem:[#allocation2 + $0x10] sm:$0xff] }
  0x9b   :  { %285 = vrot.lane.b32.xlu0 %v5674_v54, %s5450_s22 }
  0x9c   :  { %v160_v55 = vpop.permute.xlu1 %159  ;;  %v204_v56 = vpop.permute.xlu0 %203 }
  0x9d   :  { %163 = vst.msk [vmem:[#allocation2 + $0x18] sm:$0xf] %vm162_vm9, %v160_v55  ;;  %vm293_vm9 = vcmask 146432  }
  0x9e   :  { %207 = vst.msk [vmem:[#allocation2 + $0x20] sm:$0xf] %vm206_vm10, %v204_v56  ;;  %vm304_vm10 = vcmask 64512  }
  0xa0   :  { %v167_v57 = vpop.permute.xlu1 %166  ;;  %v211_v58 = vpop.permute.xlu0 %210 }
  0xa1   :  { %170 = vst.msk [vmem:[#allocation2 + $0x18] sm:$0xf] %vm169_vm11, %v167_v57  ;;  %vm5483_vm11 = vmmov 0  }
  0xa2   :  { %214 = vst.msk [vmem:[#allocation2 + $0x20] sm:$0xf] %vm213_vm12, %v211_v58  ;;  %vm532_vm12 = vcmask 154624  }
  0xa3   :  { %177 = vst.msk [vmem:[#allocation2 + $0x18] sm:$0xf] %vm176_vm13, %v174_v41  ;;  %vm772_vm13 = vcmask 138240  }
  0xa4   :  { %v218_v59 = vpop.permute.xlu0 %217  ;;  %v225_v60 = vpop.permute.xlu1 %224 }
  0xa5   :  { %221 = vst.msk [vmem:[#allocation2 + $0x20] sm:$0xf] %vm220_vm14, %v218_v59  ;;  %vm1017_vm14 = vcmask 7168  }
  0xa6   :  { %230 = vst.msk [vmem:[#allocation2 + $0x28] sm:$0xf] %vm229_vm15, %v225_v60  ;;  %vm1496_vm15 = vcmask 1039360  }
  0xa7   :  { %228 = vst.msk [vmem:[#allocation2 + $0x20] sm:$0xf] %vm227_vm1, %v225_v60  ;;  %vm1741_vm1 = vcmask 908288  }
  0xa8   :  { %v234_v61 = vpop.permute.xlu0 %233  ;;  %v241_v62 = vpop.permute.xlu1 %240 }
  0xa9   :  { %237 = vst.msk [vmem:[#allocation2 + $0x28] sm:$0xf] %vm236_vm3, %v234_v61  ;;  %v5071_v61 = vld [vmem:[%s6341_s2 + $0x20] sm:$0xff]  ;;  %vm1986_vm3 = vcmask 900096  }
  0xaa   :  { %v5678_v63 = vld [vmem:[#allocation2 + $0x18] sm:$0xff]  ;;  %244 = vst.msk [vmem:[#allocation2 + $0x28] sm:$0xf] %vm243_vm4, %v241_v62  ;;  %vm2231_vm4 = vcmask 891904  }
  0xab   :  { %287 = vrot.lane.b32.xlu0 %v5678_v63, %s5450_s22 }
  0xac   :  { %v248_v0 = vpop.permute.xlu0 %247  ;;  %v255_v1 = vpop.permute.xlu1 %254 }
  0xad   :  { %251 = vst.msk [vmem:[#allocation2 + $0x28] sm:$0xf] %vm250_vm5, %v248_v0  ;;  %vm4832_vm5 = vcmask 388352  }
  0xae   :  { %v5682_v3 = vld [vmem:[#allocation2 + $0x20] sm:$0xff]  ;;  %258 = vst.msk [vmem:[#allocation2 + $0x28] sm:$0xf] %vm257_vm6, %v255_v1 }
  0xaf   :  { %289 = vrot.lane.b32.xlu1 %v5682_v3, %s5450_s22 }
  0xb0   :  { %v262_v4 = vpop.permute.xlu0 %261  ;;  %v282_v6 = vpop.permute.xlu1 %281 }
  0xb1   :  { %265 = vst.msk [vmem:[#allocation2 + $0x28] sm:$0xf] %vm264_vm7, %v262_v4  ;;  %vm4954_vm7 = vcmask 441344  }
  0xb3   :  { %522 = vrot.lane.b32.xlu1 %v5669_v51, %s5476_s0 }
  0xb7   :  { %520 = vrot.lane.b32.xlu1 %v5444_v2, %s5476_s0 }
  0xb8   :  { %v5691_v5 = vld [vmem:[#allocation2 + $0x28] sm:$0xff] }
  0xb9   :  { %291 = vrot.lane.b32.xlu0 %v5691_v5, %s5450_s22 }
  0xbb   :  { %528 = vrot.lane.b32.xlu1 %v5682_v3, %s5476_s0 }
  0xbd   :  { %524 = vrot.lane.b32.xlu0 %v5674_v54, %s5476_s0 }
  0xbf   :  { %762 = vrot.lane.b32.xlu1 %v5669_v51, %s5477_s17 }
  0xc1   :  { %526 = vrot.lane.b32.xlu0 %v5678_v63, %s5476_s0 }
  0xc3   :  { %760 = vrot.lane.b32.xlu1 %v5444_v2, %s5477_s17 }
  0xc5   :  { %530 = vrot.lane.b32.xlu0 %v5691_v5, %s5476_s0 }
  0xc7   :  { %768 = vrot.lane.b32.xlu1 %v5682_v3, %s5477_s17 }
  0xc9   :  { %764 = vrot.lane.b32.xlu0 %v5674_v54, %s5477_s17 }
  0xcb   :  { %1007 = vrot.lane.b32.xlu1 %v5669_v51, %s5478_s18 }
  0xcd   :  { %766 = vrot.lane.b32.xlu0 %v5678_v63, %s5477_s17 }
  0xcf   :  { %1005 = vrot.lane.b32.xlu1 %v5444_v2, %s5478_s18 }
  0xd1   :  { %770 = vrot.lane.b32.xlu0 %v5691_v5, %s5477_s17 }
  0xd3   :  { %1013 = vrot.lane.b32.xlu1 %v5682_v3, %s5478_s18 }
  0xd5   :  { %1009 = vrot.lane.b32.xlu0 %v5674_v54, %s5478_s18 }
  0xd7   :  { %1484 = vrot.lane.b32.xlu1 %v5669_v51, %s5479_s19 }
  0xd9   :  { %1011 = vrot.lane.b32.xlu0 %v5678_v63, %s5478_s18 }
  0xdb   :  { %1486 = vrot.lane.b32.xlu1 %v5674_v54, %s5479_s19 }
  0xdd   :  { %1015 = vrot.lane.b32.xlu0 %v5691_v5, %s5478_s18 }
  0xdf   :  { %1492 = vrot.lane.b32.xlu1 %v5691_v5, %s5479_s19 }
  0xe1   :  { %1488 = vrot.lane.b32.xlu0 %v5678_v63, %s5479_s19 }
  0xe3   :  { %1729 = vrot.lane.b32.xlu1 %v5669_v51, %s5480_s20 }
  0xe5   :  { %1490 = vrot.lane.b32.xlu0 %v5682_v3, %s5479_s19 }
  0xe7   :  { %1731 = vrot.lane.b32.xlu1 %v5674_v54, %s5480_s20 }
  0xe9   :  { %1494 = vrot.lane.b32.xlu0 %v5444_v2, %s5479_s19 }
  0xeb   :  { %1737 = vrot.lane.b32.xlu1 %v5691_v5, %s5480_s20 }
  0xed   :  { %1733 = vrot.lane.b32.xlu0 %v5678_v63, %s5480_s20 }
  0xef   :  { %1976 = vrot.lane.b32.xlu1 %v5674_v54, %s5481_s21 }
  0xf1   :  { %1735 = vrot.lane.b32.xlu0 %v5682_v3, %s5480_s20 }
  0xf3   :  { %1974 = vrot.lane.b32.xlu1 %v5669_v51, %s5481_s21 }
  0xf5   :  { %1739 = vrot.lane.b32.xlu0 %v5444_v2, %s5480_s20 }
  0xf7   :  { %1982 = vrot.lane.b32.xlu1 %v5691_v5, %s5481_s21 }
  0xf9   :  { %1978 = vrot.lane.b32.xlu0 %v5678_v63, %s5481_s21 }
  0xfb   :  { %2221 = vrot.lane.b32.xlu1 %v5674_v54, %s5482_s23 }
  0xfd   :  { %1980 = vrot.lane.b32.xlu0 %v5682_v3, %s5481_s21 }
  0xff   :  { %2219 = vrot.lane.b32.xlu1 %v5669_v51, %s5482_s23 }
 0x101   :  { %1984 = vrot.lane.b32.xlu0 %v5444_v2, %s5481_s21 }
 0x103   :  { %2227 = vrot.lane.b32.xlu1 %v5691_v5, %s5482_s23 }
 0x105   :  { %2223 = vrot.lane.b32.xlu0 %v5678_v63, %s5482_s23 }
 0x109   :  { %2225 = vrot.lane.b32.xlu0 %v5682_v3, %s5482_s23  ;;  %v284_v7 = vpop.permute.xlu1 %283 }
 0x10a   :  { %v294_v11 = vsel %vm293_vm9, %v282_v6, %v284_v7 }
 0x10d   :  { %v286_v8 = vpop.permute.xlu0 %285  ;;  %2229 = vrot.lane.b32.xlu0 %v5444_v2, %s5482_s23 }
 0x10e   :  { %v295_v9 = vsel %vm293_vm9, %v284_v7, %v286_v8 }
 0x10f   :  { %308 = vmatprep.subr.mxu0 %v295_v9 }
 0x110   :  { %309 = vmatpush1.msra.mxu0 %v294_v11 }
 0x111   :  { %5057 = vmatmul.mubr.msk.f32.vlgmr.msra.gmra.mrb[0].mxu0 %vm304_vm10, %v5056_v10 }
 0x112   :  { %443 = vmatprep.mubr.f32.mxu0 %v5444_v2 }
 0x11d   :  { %v288_v12 = vpop.permute.xlu0 %287 }
 0x11e   :  { %v296_v15 = vsel %vm293_vm9, %v286_v8, %v288_v12 }
 0x121   :  { %v290_v13 = vpop.permute.xlu1 %289 }
 0x122   :  { %v297_v14 = vsel %vm293_vm9, %v288_v12, %v290_v13 }
 0x123   :  { %379 = vmatprep.subr.mxu0 %v297_v14 }
 0x124   :  { %380 = vmatpush1.msra.mxu0 %v296_v15 }
 0x125   :  { %v523_v16 = vpop.permute.xlu1 %522  ;;  %5058 = vmatmul.mubr.msk.f32.vlgmr.msra.gmra.mrb[2].mxu0 %vm304_vm10, %v5056_v10  ;;  %5178 = vmatprep.subr.mxu0 %v5444_v2 }
 0x126   :  { %5180 = vmatprep.mubr.msk.f32.mxu0 %vm5483_vm11, %v5444_v2 }
 0x129   :  { %v521_v17 = vpop.permute.xlu1 %520 }
 0x12a   :  { %v533_v25 = vsel %vm532_vm12, %v521_v17, %v523_v16 }
 0x12b   :  { %v292_v18 = vpop.permute.xlu0 %291 }
 0x12c   :  { %v298_v19 = vsel %vm293_vm9, %v290_v13, %v292_v18 }
 0x12d   :  { %v529_v20 = vpop.permute.xlu1 %528  ;;  %5179 = vmatpush3.msra.mxu0 %v298_v19 }
 0x12e   :  { %5181 = vmatmul.mubr.msk.f32.vlgmr.msra.gmra.mrb[4].mxu0 %vm304_vm10, %v5056_v10 }
 0x12f   :  { %v525_v21 = vpop.permute.xlu0 %524  ;;  %610 = vmatprep.mubr.f32.mxu0 %v5444_v2 }
 0x130   :  { %v534_v23 = vsel %vm532_vm12, %v523_v16, %v525_v21  ;;  %v5079_v16 = vld [vmem:[%s6341_s2 + $0x30] sm:$0xff] }
 0x131   :  { %v763_v22 = vpop.permute.xlu1 %762  ;;  %546 = vmatprep.subr.mxu0 %v534_v23 }
 0x132   :  { %547 = vmatpush1.msra.mxu0 %v533_v25 }
 0x133   :  { %v527_v26 = vpop.permute.xlu0 %526  ;;  %5060 = vmatmul.mubr.msk.f32.vlgmr.msra.gmra.mrb[0].mxu0 %vm304_vm10, %v266_v24 }
 0x134   :  { %v536_v28 = vsel %vm532_vm12, %v527_v26, %v529_v20  ;;  %v535_v29 = vsel %vm532_vm12, %v525_v21, %v527_v26  ;;  %681 = vmatprep.mubr.f32.mxu0 %v5444_v2  ;;  %v5083_v26 = vld [vmem:[%s6341_s2 + $0x38] sm:$0xff] }
 0x135   :  { %v761_v27 = vpop.permute.xlu1 %760  ;;  %617 = vmatprep.subr.mxu0 %v536_v28 }
 0x136   :  { %618 = vmatpush1.msra.mxu0 %v535_v29  ;;  %v773_v37 = vsel %vm772_vm13, %v761_v27, %v763_v22 }
 0x137   :  { %v531_v30 = vpop.permute.xlu0 %530  ;;  %5061 = vmatmul.mubr.msk.f32.vlgmr.msra.gmra.mrb[2].mxu0 %vm304_vm10, %v266_v24  ;;  %5183 = vmatprep.subr.mxu0 %v5444_v2 }
 0x138   :  { %v537_v31 = vsel %vm532_vm12, %v529_v20, %v531_v30  ;;  %5185 = vmatprep.mubr.msk.f32.mxu0 %vm5483_vm11, %v5444_v2 }
 0x139   :  { %v769_v32 = vpop.permute.xlu1 %768  ;;  %5184 = vmatpush3.msra.mxu0 %v537_v31 }
 0x13b   :  { %v765_v33 = vpop.permute.xlu0 %764  ;;  %5186 = vmatmul.mubr.msk.f32.vlgmr.msra.gmra.mrb[4].mxu0 %vm304_vm10, %v266_v24 }
 0x13c   :  { %v774_v35 = vsel %vm772_vm13, %v763_v22, %v765_v33  ;;  %850 = vmatprep.mubr.f32.mxu0 %v5444_v2 }
 0x13d   :  { %v1008_v34 = vpop.permute.xlu1 %1007  ;;  %786 = vmatprep.subr.mxu0 %v774_v35 }
 0x13e   :  { %787 = vmatpush1.msra.mxu0 %v773_v37 }
 0x13f   :  { %v767_v38 = vpop.permute.xlu0 %766  ;;  %5064 = vmatmul.mubr.msk.f32.vlgmr.msra.gmra.mrb[0].mxu0 %vm304_vm10, %v5063_v36 }
 0x140   :  { %v776_v40 = vsel %vm772_vm13, %v767_v38, %v769_v32  ;;  %v775_v41 = vsel %vm772_vm13, %v765_v33, %v767_v38  ;;  %921 = vmatprep.mubr.f32.mxu0 %v5444_v2 }
 0x141   :  { %v1006_v39 = vpop.permute.xlu1 %1005  ;;  %857 = vmatprep.subr.mxu0 %v776_v40  ;;  %v2463_v40 = vlaneseq }
 0x142   :  { %858 = vmatpush1.msra.mxu0 %v775_v41  ;;  %v1018_v49 = vsel %vm1017_vm14, %v1006_v39, %v1008_v34 }
 0x143   :  { %v771_v42 = vpop.permute.xlu0 %770  ;;  %5065 = vmatmul.mubr.msk.f32.vlgmr.msra.gmra.mrb[2].mxu0 %vm304_vm10, %v5063_v36  ;;  %5188 = vmatprep.subr.mxu0 %v5444_v2  ;;  %v2464_v41 = vshrl.u32 %v2463_v40, 7 }
 0x144   :  { %v777_v43 = vsel %vm772_vm13, %v769_v32, %v771_v42  ;;  %5190 = vmatprep.mubr.msk.f32.mxu0 %vm5483_vm11, %v5444_v2 }
 0x145   :  { %v1014_v44 = vpop.permute.xlu1 %1013  ;;  %5189 = vmatpush3.msra.mxu0 %v777_v43  ;;  %v2465_v42 = vsub.s32 0, %v2464_v41  ;;  %v29_v43 = vld [vmem:[%s6342_s1] sm:$0x1f]  ;;  %s5510_s1 = smov 114  }
 0x147   :  { %v1010_v45 = vpop.permute.xlu0 %1009  ;;  %5191 = vmatmul.mubr.msk.f32.vlgmr.msra.gmra.mrb[4].mxu0 %vm304_vm10, %v5063_v36  ;;  %v5087_v36 = vld [vmem:[%s6341_s2 + $0x40] sm:$0xff] }
 0x148   :  { %v1019_v47 = vsel %vm1017_vm14, %v1008_v34, %v1010_v45  ;;  %1095 = vmatprep.mubr.f32.mxu0 %v5444_v2 }
 0x149   :  { %v1485_v46 = vpop.permute.xlu1 %1484  ;;  %1031 = vmatprep.subr.mxu0 %v1019_v47 }
 0x14a   :  { %1032 = vmatpush1.msra.mxu0 %v1018_v49 }
 0x14b   :  { %v1012_v50 = vpop.permute.xlu0 %1011  ;;  %5068 = vmatmul.mubr.msk.f32.vlgmr.msra.gmra.mrb[0].mxu0 %vm304_vm10, %v5067_v48 }
 0x14c   :  { %v1021_v53 = vsel %vm1017_vm14, %v1012_v50, %v1014_v44  ;;  %v1020_v55 = vsel %vm1017_vm14, %v1010_v45, %v1012_v50  ;;  %1166 = vmatprep.mubr.f32.mxu0 %v5444_v2  ;;  %v5921_v45 = vrot.slane %v29_v43, %v2465_v42 }
 0x14d   :  { %v1487_v52 = vpop.permute.xlu1 %1486  ;;  %1102 = vmatprep.subr.mxu0 %v1021_v53  ;;  %v2481_v53 = vsub.s32 4, %v2464_v41 }
 0x14e   :  { %1103 = vmatpush1.msra.mxu0 %v1020_v55 }
 0x14f   :  { %v1016_v56 = vpop.permute.xlu0 %1015  ;;  %5069 = vmatmul.mubr.msk.f32.vlgmr.msra.gmra.mrb[2].mxu0 %vm304_vm10, %v5067_v48  ;;  %5193 = vmatprep.subr.mxu0 %v5444_v2 }
 0x150   :  { %v1022_v57 = vsel %vm1017_vm14, %v1014_v44, %v1016_v56  ;;  %5195 = vmatprep.mubr.msk.f32.mxu0 %vm5483_vm11, %v5444_v2  ;;  %v2469_v44 = vsub.s32 1, %v2464_v41 }
 0x151   :  { %v1493_v58 = vpop.permute.xlu1 %1492  ;;  %5194 = vmatpush3.msra.mxu0 %v1022_v57 }
 0x152   :  { %1253 = vmatprep.subr.mxu0 %v5674_v54  ;;  %v5923_v47 = vrot.slane %v29_v43, %v2469_v44 }
 0x153   :  { %v1489_v59 = vpop.permute.xlu0 %1488  ;;  %5196 = vmatmul.mubr.msk.f32.vlgmr.msra.gmra.mrb[4].mxu0 %vm304_vm10, %v5067_v48  ;;  %v2477_v48 = vsub.s32 3, %v2464_v41 }
 0x154   :  { %1254 = vmatpush1.msra.mxu0 %v5669_v51  ;;  %1317 = vmatprep.mubr.f32.mxu0 %v5444_v2  ;;  %v1498_v0 = vsel %vm1496_vm15, %v1487_v52, %v1489_v59 }
 0x155   :  { %v1730_v60 = vpop.permute.xlu1 %1729  ;;  %1324 = vmatprep.subr.mxu0 %v5682_v3  ;;  %v5929_v56 = vrot.slane %v29_v43, %v2477_v48 }
 0x157   :  { %v1491_v62 = vpop.permute.xlu0 %1490  ;;  %5072 = vmatmul.mubr.msk.f32.vlgmr.msra.gmra.mrb[0].mxu0 %vm304_vm10, %v5071_v61 }
 0x158   :  { %1325 = vmatpush1.msra.mxu0 %v5678_v63  ;;  %1388 = vmatprep.mubr.f32.mxu0 %v5444_v2  ;;  %v1497_v63 = vsel %vm1496_vm15, %v1485_v46, %v1487_v52  ;;  %v1500_v4 = vsel %vm1496_vm15, %v1491_v62, %v1493_v58  ;;  %v1499_v7 = vsel %vm1496_vm15, %v1489_v59, %v1491_v62  ;;  %v2473_v46 = vsub.s32 2, %v2464_v41 }
 0x159   :  { %v1732_v54 = vpop.permute.xlu1 %1731  ;;  %5198 = vmatprep.subr.mxu0 %v5444_v2 }
 0x15a   :  { %v1742_v14 = vsel %vm1741_vm1, %v1730_v60, %v1732_v54  ;;  %v5926_v52 = vrot.slane %v29_v43, %v2473_v46 }
 0x15b   :  { %v1495_v51 = vpop.permute.xlu0 %1494  ;;  %5073 = vmatmul.mubr.msk.f32.vlgmr.msra.gmra.mrb[2].mxu0 %vm304_vm10, %v5071_v61 }
 0x15c   :  { %5199 = vmatpush3.msra.mxu0 %v5691_v5  ;;  %5200 = vmatprep.mubr.msk.f32.mxu0 %vm5483_vm11, %v5444_v2  ;;  %v5075_v5 = vld [vmem:[%s6341_s2 + $0x28] sm:$0xff]  ;;  %v1501_v9 = vsel %vm1496_vm15, %v1493_v58, %v1495_v51  ;;  %s5508_s2 = smov 54  }
 0x15d   :  { %1510 = vmatprep.subr.mxu0 %v1498_v0  ;;  %v1738_v1 = vpop.permute.xlu1 %1737 }
 0x15f   :  { %v1734_v3 = vpop.permute.xlu0 %1733  ;;  %5201 = vmatmul.mubr.msk.f32.vlgmr.msra.gmra.mrb[4].mxu0 %vm304_vm10, %v5071_v61 }
 0x160   :  { %1511 = vmatpush1.msra.mxu0 %v1497_v63  ;;  %1574 = vmatprep.mubr.f32.mxu0 %v5444_v2  ;;  %v1743_v11 = vsel %vm1741_vm1, %v1732_v54, %v1734_v3  ;;  %v5932_v54 = vrot.slane %v29_v43, %v2481_v53 }
 0x161   :  { %1581 = vmatprep.subr.mxu0 %v1500_v4  ;;  %v1977_v8 = vpop.permute.xlu1 %1976 }
 0x163   :  { %v1736_v6 = vpop.permute.xlu0 %1735  ;;  %5076 = vmatmul.mubr.msk.f32.vlgmr.msra.gmra.mrb[0].mxu0 %vm304_vm10, %v5075_v5 }
 0x164   :  { %1582 = vmatpush1.msra.mxu0 %v1499_v7  ;;  %1645 = vmatprep.mubr.f32.mxu0 %v5444_v2  ;;  %v1745_v15 = vsel %vm1741_vm1, %v1736_v6, %v1738_v1  ;;  %v1744_v17 = vsel %vm1741_vm1, %v1734_v3, %v1736_v6 }
 0x165   :  { %5203 = vmatprep.subr.mxu0 %v5444_v2  ;;  %v1975_v12 = vpop.permute.xlu1 %1974 }
 0x166   :  { %v1987_v23 = vsel %vm1986_vm3, %v1975_v12, %v1977_v8 }
 0x167   :  { %v1740_v10 = vpop.permute.xlu0 %1739  ;;  %5077 = vmatmul.mubr.msk.f32.vlgmr.msra.gmra.mrb[2].mxu0 %vm304_vm10, %v5075_v5 }
 0x168   :  { %5204 = vmatpush3.msra.mxu0 %v1501_v9  ;;  %5205 = vmatprep.mubr.msk.f32.mxu0 %vm5483_vm11, %v5444_v2  ;;  %v1746_v20 = vsel %vm1741_vm1, %v1738_v1, %v1740_v10 }
 0x169   :  { %1755 = vmatprep.subr.mxu0 %v1743_v11  ;;  %v1983_v19 = vpop.permute.xlu1 %1982 }
 0x16b   :  { %v1979_v13 = vpop.permute.xlu0 %1978  ;;  %5206 = vmatmul.mubr.msk.f32.vlgmr.msra.gmra.mrb[4].mxu0 %vm304_vm10, %v5075_v5 }
 0x16c   :  { %1756 = vmatpush1.msra.mxu0 %v1742_v14  ;;  %1819 = vmatprep.mubr.f32.mxu0 %v5444_v2  ;;  %v1988_v21 = vsel %vm1986_vm3, %v1977_v8, %v1979_v13 }
 0x16d   :  { %1826 = vmatprep.subr.mxu0 %v1745_v15  ;;  %v2222_v24 = vpop.permute.xlu1 %2221 }
 0x16f   :  { %v1981_v18 = vpop.permute.xlu0 %1980  ;;  %5080 = vmatmul.mubr.msk.f32.vlgmr.msra.gmra.mrb[0].mxu0 %vm304_vm10, %v5079_v16 }
 0x170   :  { %1827 = vmatpush1.msra.mxu0 %v1744_v17  ;;  %1890 = vmatprep.mubr.f32.mxu0 %v5444_v2  ;;  %v1990_v25 = vsel %vm1986_vm3, %v1981_v18, %v1983_v19  ;;  %v1989_v27 = vsel %vm1986_vm3, %v1979_v13, %v1981_v18  ;;  %v5484_v13 = vmov 0  }
 0x171   :  { %5208 = vmatprep.subr.mxu0 %v5444_v2  ;;  %v2220_v29 = vpop.permute.xlu1 %2219  ;;  %5433 = vset.pattern.permute.xlu0 %v5484_v13 }
 0x172   :  { %v2232_v33 = vsel %vm2231_vm4, %v2220_v29, %v2222_v24  ;;  %5434 = vset.pattern.permute.xlu1 %v5484_v13  ;;  %v2559_v13 = vld [vmem:[%s6345_s5] sm:$0xff] }
 0x173   :  { %5081 = vmatmul.mubr.msk.f32.vlgmr.msra.gmra.mrb[2].mxu0 %vm304_vm10, %v5079_v16  ;;  %v1985_v22 = vpop.permute.xlu0 %1984 }
 0x174   :  { %5209 = vmatpush3.msra.mxu0 %v1746_v20  ;;  %5210 = vmatprep.mubr.msk.f32.mxu0 %vm5483_vm11, %v5444_v2  ;;  %v1991_v30 = vsel %vm1986_vm3, %v1983_v19, %v1985_v22 }
 0x175   :  { %2000 = vmatprep.subr.mxu0 %v1988_v21  ;;  %v2228_v34 = vpop.permute.xlu1 %2227  ;;  %v2515_v21 = vld [vmem:[%s6343_s3] sm:$0xff]  ;;  %s5490_s3 = smov 42  }
 0x177   :  { %5211 = vmatmul.mubr.msk.f32.vlgmr.msra.gmra.mrb[4].mxu0 %vm304_vm10, %v5079_v16  ;;  %v2224_v28 = vpop.permute.xlu0 %2223 }
 0x178   :  { %2001 = vmatpush1.msra.mxu0 %v1987_v23  ;;  %2064 = vmatprep.mubr.f32.mxu0 %v5444_v2  ;;  %v2233_v31 = vsel %vm2231_vm4, %v2222_v24, %v2224_v28  ;;  %v2519_v24 = vld [vmem:[%s6344_s4] sm:$0xff]  ;;  %s5491_s4 = smov 124  }
 0x179   :  { %2071 = vmatprep.subr.mxu0 %v1990_v25 }
 0x17b   :  { %5084 = vmatmul.mubr.msk.f32.vlgmr.msra.gmra.mrb[0].mxu0 %vm304_vm10, %v5083_v26  ;;  %v2226_v32 = vpop.permute.xlu0 %2225 }
 0x17c   :  { %2072 = vmatpush1.msra.mxu0 %v1989_v27  ;;  %2135 = vmatprep.mubr.f32.mxu0 %v5444_v2  ;;  %v2235_v35 = vsel %vm2231_vm4, %v2226_v32, %v2228_v34  ;;  %v2234_v37 = vsel %vm2231_vm4, %v2224_v28, %v2226_v32  ;;  %v5942_v27 = vld [vmem:[#allocation2] sm:$0xff] }
 0x17d   :  { %5213 = vmatprep.subr.mxu0 %v5444_v2 }
 0x17f   :  { %5085 = vmatmul.mubr.msk.f32.vlgmr.msra.gmra.mrb[2].mxu0 %vm304_vm10, %v5083_v26  ;;  %v2230_v38 = vpop.permute.xlu0 %2229 }
 0x180   :  { %5214 = vmatpush3.msra.mxu0 %v1991_v30  ;;  %5215 = vmatprep.mubr.msk.f32.mxu0 %vm5483_vm11, %v5444_v2  ;;  %v2236_v39 = vsel %vm2231_vm4, %v2228_v34, %v2230_v38 }
 0x181   :  { %2245 = vmatprep.subr.mxu0 %v2233_v31 }
 0x183   :  { %5216 = vmatmul.mubr.msk.f32.vlgmr.msra.gmra.mrb[4].mxu0 %vm304_vm10, %v5083_v26 }
 0x184   :  { %2246 = vmatpush1.msra.mxu0 %v2232_v33  ;;  %2309 = vmatprep.mubr.f32.mxu0 %v5444_v2 }
 0x185   :  { %2316 = vmatprep.subr.mxu0 %v2235_v35 }
 0x187   :  { %5088 = vmatmul.mubr.msk.f32.vlgmr.msra.gmra.mrb[0].mxu0 %vm304_vm10, %v5087_v36 }
 0x188   :  { %2317 = vmatpush1.msra.mxu0 %v2234_v37  ;;  %2380 = vmatprep.mubr.f32.mxu0 %v5444_v2 }
 0x189   :  { %5218 = vmatprep.subr.mxu0 %v5444_v2 }
 0x18b   :  { %5089 = vmatmul.mubr.msk.f32.vlgmr.msra.gmra.mrb[2].mxu0 %vm304_vm10, %v5087_v36 }
 0x18c   :  { %5219 = vmatpush3.msra.mxu0 %v2236_v39  ;;  %5220 = vmatprep.mubr.msk.f32.mxu0 %vm5483_vm11, %v5444_v2 }
 0x18f   :  { %5221 = vmatmul.mubr.msk.f32.vlgmr.msra.gmra.mrb[4].mxu0 %vm304_vm10, %v5087_v36 }
 0x25a   :  { %v2311_v49 = vpop.f32.mrb[0].mxu0 }
 0x25b   :  { %v2488_v50 = vmul.f32 %v5921_v45, %v2311_v49  ;;  %v2313_v2 = vpop.f32.mrb[1].mxu0 }
 0x25c   :  { %v2489_v55 = vmul.f32 %v5923_v47, %v2313_v2 }
 0x25d   :  { %v2499_v57 = vmul.f32 %v2488_v50, %v2311_v49 }
 0x25e   :  { %v2493_v58 = vadd.f32 %v2489_v55, %v2488_v50  ;;  %v2500_v59 = vmul.f32 %v2489_v55, %v2313_v2  ;;  %v2382_v60 = vpop.f32.mrb[2].mxu0 }
 0x25f   :  { %v2490_v61 = vmul.f32 %v5926_v52, %v2382_v60  ;;  %v2384_v62 = vpop.f32.mrb[3].mxu0 }
 0x260   :  { %v2504_v51 = vadd.f32 %v2500_v59, %v2499_v57  ;;  %v2491_v0 = vmul.f32 %v5929_v56, %v2384_v62 }
 0x261   :  { %v2501_v1 = vmul.f32 %v2490_v61, %v2382_v60  ;;  %v2494_v3 = vadd.f32 %v2493_v58, %v2490_v61 }
 0x262   :  { %v2502_v63 = vmul.f32 %v2491_v0, %v2384_v62  ;;  %v2453_v4 = vpop.f32.mrb[4].mxu0 }
 0x263   :  { %v5222_v5 = vpop.f32.mrb[5].mxu0  ;;  %v2492_v6 = vmul.f32 %v5932_v54, %v2453_v4  ;;  %v2495_v7 = vadd.f32 %v2494_v3, %v2491_v0  ;;  %v2505_v8 = vadd.f32 %v2504_v51, %v2501_v1 }
 0x265   :  { %v2496_v9 = vadd.f32 %v2495_v7, %v2492_v6  ;;  %v2503_v10 = vmul.f32 %v2492_v6, %v2453_v4  ;;  %v2506_v11 = vadd.f32 %v2505_v8, %v2502_v63 }
 0x267   :  { %2497 = vadd.xlane.f32.xlu1 %v2496_v9  ;;  %v2507_v12 = vadd.f32 %v2506_v11, %v2503_v10 }
 0x269   :  { %2508 = vadd.xlane.f32.xlu0 %v2507_v12 }
 0x2f4   :  { %v2498_v14 = vpop.xlane.xlu1 %2497 }
 0x2f5   :  { %v2511_v15 = vmul.f32 0.001953125, %v2498_v14 }
 0x2f6   :  { %v2509_v16 = vpop.xlane.xlu0 %2508 }
 0x2f7   :  { %v2513_v17 = vmul.f32 %v2511_v15, %v2511_v15  ;;  %v2512_v18 = vmul.f32 0.001953125, %v2509_v16 }
 0x2f9   :  { %v2514_v19 = vsub.f32 %v2512_v18, %v2513_v17 }
 0x2fb   :  { %v2516_v20 = vadd.f32 1e-05, %v2514_v19 }
 0x2fd   :  { %5439 = vrsqrt.f32 %v2516_v20 }
 0x307   :  { %v5440_v22 = vpop.eup %5439 }
 0x308   :  { %v2518_v23 = vmul.f32 %v5440_v22, %v2515_v21 }
 0x30a   :  { %2524 = vperm.xlu0 %5433, %v2518_v23   ;;  %v2520_v25 = vmul.f32 %v2518_v23, %v2511_v15 }
 0x30c   :  { %v2521_v26 = vsub.f32 %v2519_v24, %v2520_v25  ;;  %v5098_v24 = vld [vmem:[%s6345_s5 + $0x10] sm:$0xff] }
 0x30e   :  { %2534 = vperm.xlu1 %5434, %v2521_v26  }
 0x312   :  { %2574 = vrot.lane.b32.xlu1 %v5942_v27, %s5450_s22 }
 0x316   :  { %2811 = vrot.lane.b32.xlu1 %v5942_v27, %s5476_s0 }
 0x389   :  { %v2525_v28 = vpop.permute.xlu0 %2524 }
 0x38a   :  { %v2527_v29 = vmul.f32 %v2525_v28, %v2311_v49  ;;  %v2528_v30 = vmul.f32 %v2525_v28, %v2313_v2  ;;  %v2529_v31 = vmul.f32 %v2525_v28, %v2382_v60  ;;  %v2531_v36 = vmul.f32 %v2525_v28, %v2453_v4 }
 0x38b   :  { %v2530_v43 = vmul.f32 %v2525_v28, %v2384_v62  ;;  %v5091_v62 = vld [vmem:[%s6345_s5 + $0x8] sm:$0xff] }
 0x38d   :  { %v2535_v32 = vpop.permute.xlu1 %2534 }
 0x38e   :  { %v2537_v33 = vadd.f32 %v2535_v32, %v2527_v29  ;;  %v2538_v34 = vadd.f32 %v2535_v32, %v2528_v30  ;;  %v2539_v35 = vadd.f32 %v2535_v32, %v2529_v31  ;;  %v2541_v39 = vadd.f32 %v2535_v32, %v2531_v36  ;;  %v5102_v36 = vld [vmem:[%s6345_s5 + $0x18] sm:$0xff] }
 0x38f   :  { %v2540_v44 = vadd.f32 %v2535_v32, %v2530_v43 }
 0x390   :  { %v2542_v37 = vmax.f32 %v2537_v33, 0.0  ;;  %v2543_v38 = vmax.f32 %v2538_v34, 0.0  ;;  %v2544_v40 = vmax.f32 %v2539_v35, 0.0  ;;  %v2546_v46 = vmax.f32 %v2541_v39, 0.0 }
 0x391   :  { %v2545_v49 = vmax.f32 %v2540_v44, 0.0  ;;  %v2575_v53 = vpop.permute.xlu1 %2574 }
 0x392   :  { %v5949_v41 = vmul.f32 %v2542_v37, %v5921_v45  ;;  %v5952_v42 = vmul.f32 %v2543_v38, %v5923_v47  ;;  %v5959_v48 = vmul.f32 %v2544_v40, %v5926_v52  ;;  %v5966_v50 = vmul.f32 %v2546_v46, %v5932_v54 }
 0x393   :  { %v5973_v2 = vmul.f32 %v2545_v49, %v5929_v56 }
 0x394   :  { %2815 = vrot.lane.b32.xlu0 %v5952_v42, %s5476_s0  ;;  %2576 = vrot.lane.b32.xlu1 %v5949_v41, %s5450_s22 }
 0x395   :  { %v2812_v55 = vpop.permute.xlu1 %2811 }
 0x398   :  { %2817 = vrot.lane.b32.xlu0 %v5959_v48, %s5476_s0  ;;  %2578 = vrot.lane.b32.xlu1 %v5952_v42, %s5450_s22 }
 0x39c   :  { %2821 = vrot.lane.b32.xlu0 %v5966_v50, %s5476_s0  ;;  %2580 = vrot.lane.b32.xlu1 %v5959_v48, %s5450_s22 }
 0x3a0   :  { %3054 = vrot.lane.b32.xlu0 %v5952_v42, %s5477_s17  ;;  %2582 = vrot.lane.b32.xlu1 %v5973_v2, %s5450_s22 }
 0x3a4   :  { %3056 = vrot.lane.b32.xlu0 %v5959_v48, %s5477_s17  ;;  %2584 = vrot.lane.b32.xlu1 %v5966_v50, %s5450_s22 }
 0x3a8   :  { %3060 = vrot.lane.b32.xlu0 %v5966_v50, %s5477_s17  ;;  %2813 = vrot.lane.b32.xlu1 %v5949_v41, %s5476_s0 }
 0x3ac   :  { %3298 = vrot.lane.b32.xlu0 %v5952_v42, %s5478_s18  ;;  %2819 = vrot.lane.b32.xlu1 %v5973_v2, %s5476_s0 }
 0x3b0   :  { %3300 = vrot.lane.b32.xlu0 %v5959_v48, %s5478_s18  ;;  %3050 = vrot.lane.b32.xlu1 %v5942_v27, %s5477_s17 }
 0x3b4   :  { %3304 = vrot.lane.b32.xlu0 %v5966_v50, %s5478_s18  ;;  %3052 = vrot.lane.b32.xlu1 %v5949_v41, %s5477_s17 }
 0x3b8   :  { %3776 = vrot.lane.b32.xlu0 %v5959_v48, %s5479_s19  ;;  %3058 = vrot.lane.b32.xlu1 %v5973_v2, %s5477_s17  ;;  %s5492_s17 = smov 108  }
 0x3bc   :  { %3778 = vrot.lane.b32.xlu0 %v5973_v2, %s5479_s19  ;;  %3294 = vrot.lane.b32.xlu1 %v5942_v27, %s5478_s18 }
 0x3c0   :  { %3782 = vrot.lane.b32.xlu0 %v5942_v27, %s5479_s19  ;;  %3296 = vrot.lane.b32.xlu1 %v5949_v41, %s5478_s18 }
 0x3c4   :  { %4020 = vrot.lane.b32.xlu0 %v5959_v48, %s5480_s20  ;;  %3302 = vrot.lane.b32.xlu1 %v5973_v2, %s5478_s18  ;;  %s5493_s18 = smov 56  }
 0x3c8   :  { %4022 = vrot.lane.b32.xlu0 %v5973_v2, %s5480_s20  ;;  %3774 = vrot.lane.b32.xlu1 %v5952_v42, %s5479_s19 }
 0x3cc   :  { %4026 = vrot.lane.b32.xlu0 %v5942_v27, %s5480_s20  ;;  %3772 = vrot.lane.b32.xlu1 %v5949_v41, %s5479_s19 }
 0x3d0   :  { %4264 = vrot.lane.b32.xlu0 %v5959_v48, %s5481_s21  ;;  %3780 = vrot.lane.b32.xlu1 %v5966_v50, %s5479_s19  ;;  %s5495_s19 = smov 106  }
 0x3d4   :  { %4266 = vrot.lane.b32.xlu0 %v5973_v2, %s5481_s21  ;;  %4018 = vrot.lane.b32.xlu1 %v5952_v42, %s5480_s20 }
 0x3d8   :  { %4270 = vrot.lane.b32.xlu0 %v5942_v27, %s5481_s21  ;;  %4016 = vrot.lane.b32.xlu1 %v5949_v41, %s5480_s20 }
 0x3dc   :  { %4508 = vrot.lane.b32.xlu0 %v5959_v48, %s5482_s23  ;;  %4024 = vrot.lane.b32.xlu1 %v5966_v50, %s5480_s20  ;;  %s5496_s20 = smov 120  }
 0x3e0   :  { %4510 = vrot.lane.b32.xlu0 %v5973_v2, %s5482_s23  ;;  %4262 = vrot.lane.b32.xlu1 %v5952_v42, %s5481_s21 }
 0x3e4   :  { %4260 = vrot.lane.b32.xlu1 %v5949_v41, %s5481_s21  ;;  %4514 = vrot.lane.b32.xlu0 %v5942_v27, %s5482_s23 }
 0x3e8   :  { %4268 = vrot.lane.b32.xlu1 %v5966_v50, %s5481_s21 }
 0x3ec   :  { %4506 = vrot.lane.b32.xlu1 %v5952_v42, %s5482_s23 }
 0x3f0   :  { %4504 = vrot.lane.b32.xlu1 %v5949_v41, %s5482_s23 }
 0x3f4   :  { %4512 = vrot.lane.b32.xlu1 %v5966_v50, %s5482_s23  ;;  %s5497_s23 = smov 38  }
 0x406   :  { %v2816_v57 = vpop.permute.xlu0 %2815  ;;  %v2577_v58 = vpop.permute.xlu1 %2576 }
 0x407   :  { %v2586_v51 = vsel %vm293_vm9, %v2575_v53, %v2577_v58  ;;  %v5106_v53 = vld [vmem:[%s6345_s5 + $0x20] sm:$0xff] }
 0x40a   :  { %v2818_v59 = vpop.permute.xlu0 %2817  ;;  %v2579_v60 = vpop.permute.xlu1 %2578 }
 0x40b   :  { %v2587_v61 = vsel %vm293_vm9, %v2577_v58, %v2579_v60  ;;  %v2825_v16 = vsel %vm532_vm12, %v2816_v57, %v2818_v59 }
 0x40c   :  { %2599 = vmatprep.subr.mxu1 %v2587_v61 }
 0x40d   :  { %2600 = vmatpush1.msra.mxu1 %v2586_v51 }
 0x40e   :  { %v2822_v0 = vpop.permute.xlu0 %2821  ;;  %v2581_v1 = vpop.permute.xlu1 %2580  ;;  %5092 = vmatmul.mubr.msk.f32.vlgmr.msra.gmra.mrb[0].mxu1 %vm304_vm10, %v5091_v62 }
 0x40f   :  { %2734 = vmatprep.mubr.f32.mxu1 %v5942_v27  ;;  %v2588_v5 = vsel %vm293_vm9, %v2579_v60, %v2581_v1 }
 0x412   :  { %v3055_v3 = vpop.permute.xlu0 %3054  ;;  %v2583_v63 = vpop.permute.xlu1 %2582 }
 0x413   :  { %v2589_v4 = vsel %vm293_vm9, %v2581_v1, %v2583_v63 }
 0x414   :  { %2670 = vmatprep.subr.mxu1 %v2589_v4 }
 0x415   :  { %2671 = vmatpush1.msra.mxu1 %v2588_v5 }
 0x416   :  { %v3057_v6 = vpop.permute.xlu0 %3056  ;;  %5093 = vmatmul.mubr.msk.f32.vlgmr.msra.gmra.mrb[2].mxu1 %vm304_vm10, %v5091_v62  ;;  %v2585_v7 = vpop.permute.xlu1 %2584  ;;  %5223 = vmatprep.subr.mxu1 %v5942_v27 }
 0x417   :  { %v2590_v8 = vsel %vm293_vm9, %v2583_v63, %v2585_v7  ;;  %5225 = vmatprep.mubr.msk.f32.mxu1 %vm5483_vm11, %v5942_v27  ;;  %v3064_v28 = vsel %vm772_vm13, %v3055_v3, %v3057_v6  ;;  %vm5002_vm9 = vcmask 326656  }
 0x418   :  { %5224 = vmatpush3.msra.mxu1 %v2590_v8 }
 0x41a   :  { %v3061_v9 = vpop.permute.xlu0 %3060  ;;  %5226 = vmatmul.mubr.msk.f32.vlgmr.msra.gmra.mrb[4].mxu1 %vm304_vm10, %v5091_v62  ;;  %v2814_v10 = vpop.permute.xlu1 %2813 }
 0x41b   :  { %v2823_v11 = vsel %vm532_vm12, %v2812_v55, %v2814_v10  ;;  %v2824_v12 = vsel %vm532_vm12, %v2814_v10, %v2816_v57  ;;  %2900 = vmatprep.mubr.f32.mxu1 %v5942_v27 }
 0x41c   :  { %2836 = vmatprep.subr.mxu1 %v2824_v12 }
 0x41d   :  { %2837 = vmatpush1.msra.mxu1 %v2823_v11 }
 0x41e   :  { %5095 = vmatmul.mubr.msk.f32.vlgmr.msra.gmra.mrb[0].mxu1 %vm304_vm10, %v2559_v13  ;;  %v2820_v14 = vpop.permute.xlu1 %2819  ;;  %v3299_v17 = vpop.permute.xlu0 %3298 }
 0x41f   :  { %v2826_v15 = vsel %vm532_vm12, %v2818_v59, %v2820_v14  ;;  %2971 = vmatprep.mubr.f32.mxu1 %v5942_v27  ;;  %v2827_v18 = vsel %vm532_vm12, %v2820_v14, %v2822_v0  ;;  %vm4917_vm12 = vcmask 818176  }
 0x420   :  { %2907 = vmatprep.subr.mxu1 %v2826_v15 }
 0x421   :  { %2908 = vmatpush1.msra.mxu1 %v2825_v16  ;;  %v5118_v16 = vld [vmem:[%s6345_s5 + $0x38] sm:$0xff] }
 0x422   :  { %5096 = vmatmul.mubr.msk.f32.vlgmr.msra.gmra.mrb[2].mxu1 %vm304_vm10, %v2559_v13  ;;  %5228 = vmatprep.subr.mxu1 %v5942_v27  ;;  %v3051_v19 = vpop.permute.xlu1 %3050  ;;  %v3301_v20 = vpop.permute.xlu0 %3300 }
 0x423   :  { %5229 = vmatpush3.msra.mxu1 %v2827_v18  ;;  %5230 = vmatprep.mubr.msk.f32.mxu1 %vm5483_vm11, %v5942_v27  ;;  %v3308_v39 = vsel %vm1017_vm14, %v3299_v17, %v3301_v20 }
 0x426   :  { %5231 = vmatmul.mubr.msk.f32.vlgmr.msra.gmra.mrb[4].mxu1 %vm304_vm10, %v2559_v13  ;;  %v3053_v21 = vpop.permute.xlu1 %3052  ;;  %v3305_v29 = vpop.permute.xlu0 %3304 }
 0x427   :  { %v3062_v22 = vsel %vm772_vm13, %v3051_v19, %v3053_v21  ;;  %v3063_v23 = vsel %vm772_vm13, %v3053_v21, %v3055_v3  ;;  %3139 = vmatprep.mubr.f32.mxu1 %v5942_v27 }
 0x428   :  { %3075 = vmatprep.subr.mxu1 %v3063_v23 }
 0x429   :  { %3076 = vmatpush1.msra.mxu1 %v3062_v22 }
 0x42a   :  { %5099 = vmatmul.mubr.msk.f32.vlgmr.msra.gmra.mrb[0].mxu1 %vm304_vm10, %v5098_v24  ;;  %v3059_v25 = vpop.permute.xlu1 %3058  ;;  %v3777_v32 = vpop.permute.xlu0 %3776 }
 0x42b   :  { %v3065_v26 = vsel %vm772_vm13, %v3057_v6, %v3059_v25  ;;  %3210 = vmatprep.mubr.f32.mxu1 %v5942_v27  ;;  %v3066_v30 = vsel %vm772_vm13, %v3059_v25, %v3061_v9  ;;  %v5114_v6 = vld [vmem:[%s6345_s5 + $0x30] sm:$0xff] }
 0x42c   :  { %3146 = vmatprep.subr.mxu1 %v3065_v26  ;;  %v5122_v26 = vld [vmem:[%s6345_s5 + $0x40] sm:$0xff] }
 0x42d   :  { %3147 = vmatpush1.msra.mxu1 %v3064_v28 }
 0x42e   :  { %5100 = vmatmul.mubr.msk.f32.vlgmr.msra.gmra.mrb[2].mxu1 %vm304_vm10, %v5098_v24  ;;  %5233 = vmatprep.subr.mxu1 %v5942_v27  ;;  %v3295_v31 = vpop.permute.xlu1 %3294  ;;  %v3779_v40 = vpop.permute.xlu0 %3778 }
 0x42f   :  { %5234 = vmatpush3.msra.mxu1 %v3066_v30  ;;  %5235 = vmatprep.mubr.msk.f32.mxu1 %vm5483_vm11, %v5942_v27  ;;  %v3786_v60 = vsel %vm1496_vm15, %v3777_v32, %v3779_v40 }
 0x432   :  { %5236 = vmatmul.mubr.msk.f32.vlgmr.msra.gmra.mrb[4].mxu1 %vm304_vm10, %v5098_v24  ;;  %v3297_v33 = vpop.permute.xlu1 %3296  ;;  %v3783_v46 = vpop.permute.xlu0 %3782 }
 0x433   :  { %v3306_v34 = vsel %vm1017_vm14, %v3295_v31, %v3297_v33  ;;  %v3307_v35 = vsel %vm1017_vm14, %v3297_v33, %v3299_v17  ;;  %3383 = vmatprep.mubr.f32.mxu1 %v5942_v27 }
 0x434   :  { %3319 = vmatprep.subr.mxu1 %v3307_v35 }
 0x435   :  { %3320 = vmatpush1.msra.mxu1 %v3306_v34 }
 0x436   :  { %5103 = vmatmul.mubr.msk.f32.vlgmr.msra.gmra.mrb[0].mxu1 %vm304_vm10, %v5102_v36  ;;  %v3303_v37 = vpop.permute.xlu1 %3302 }
 0x437   :  { %v3309_v38 = vsel %vm1017_vm14, %v3301_v20, %v3303_v37  ;;  %3454 = vmatprep.mubr.f32.mxu1 %v5942_v27  ;;  %v3310_v43 = vsel %vm1017_vm14, %v3303_v37, %v3305_v29 }
 0x438   :  { %3390 = vmatprep.subr.mxu1 %v3309_v38 }
 0x439   :  { %3391 = vmatpush1.msra.mxu1 %v3308_v39 }
 0x43a   :  { %5104 = vmatmul.mubr.msk.f32.vlgmr.msra.gmra.mrb[2].mxu1 %vm304_vm10, %v5102_v36  ;;  %5238 = vmatprep.subr.mxu1 %v5942_v27  ;;  %v3775_v44 = vpop.permute.xlu1 %3774 }
 0x43b   :  { %5239 = vmatpush3.msra.mxu1 %v3310_v43  ;;  %5240 = vmatprep.mubr.msk.f32.mxu1 %vm5483_vm11, %v5942_v27  ;;  %v3785_v57 = vsel %vm1496_vm15, %v3775_v44, %v3777_v32 }
 0x43c   :  { %3541 = vmatprep.subr.mxu1 %v5952_v42  ;;  %v4021_v42 = vpop.permute.xlu0 %4020 }
 0x43e   :  { %5241 = vmatmul.mubr.msk.f32.vlgmr.msra.gmra.mrb[4].mxu1 %vm304_vm10, %v5102_v36  ;;  %v3773_v49 = vpop.permute.xlu1 %3772 }
 0x43f   :  { %3542 = vmatpush1.msra.mxu1 %v5949_v41  ;;  %3605 = vmatprep.mubr.f32.mxu1 %v5942_v27  ;;  %v3784_v58 = vsel %vm1496_vm15, %v3773_v49, %v3775_v44 }
 0x440   :  { %3612 = vmatprep.subr.mxu1 %v5973_v2  ;;  %v4023_v2 = vpop.permute.xlu0 %4022 }
 0x441   :  { %v4030_v7 = vsel %vm1741_vm1, %v4021_v42, %v4023_v2 }
 0x442   :  { %5107 = vmatmul.mubr.msk.f32.vlgmr.msra.gmra.mrb[0].mxu1 %vm304_vm10, %v5106_v53  ;;  %v3781_v55 = vpop.permute.xlu1 %3780 }
 0x443   :  { %3613 = vmatpush1.msra.mxu1 %v5959_v48  ;;  %3676 = vmatprep.mubr.f32.mxu1 %v5942_v27  ;;  %v3787_v59 = vsel %vm1496_vm15, %v3779_v40, %v3781_v55  ;;  %v3788_v51 = vsel %vm1496_vm15, %v3781_v55, %v3783_v46 }
 0x444   :  { %5243 = vmatprep.subr.mxu1 %v5942_v27  ;;  %v4027_v62 = vpop.permute.xlu0 %4026 }
 0x446   :  { %5108 = vmatmul.mubr.msk.f32.vlgmr.msra.gmra.mrb[2].mxu1 %vm304_vm10, %v5106_v53  ;;  %v4019_v41 = vpop.permute.xlu1 %4018 }
 0x447   :  { %5244 = vmatpush3.msra.mxu1 %v5966_v50  ;;  %5245 = vmatprep.mubr.msk.f32.mxu1 %vm5483_vm11, %v5942_v27  ;;  %v5110_v50 = vld [vmem:[%s6345_s5 + $0x28] sm:$0xff]  ;;  %v4029_v1 = vsel %vm1741_vm1, %v4019_v41, %v4021_v42  ;;  %s5507_s5 = smov 32  }
 0x448   :  { %3797 = vmatprep.subr.mxu1 %v3785_v57  ;;  %v4265_v3 = vpop.permute.xlu0 %4264 }
 0x44a   :  { %5246 = vmatmul.mubr.msk.f32.vlgmr.msra.gmra.mrb[4].mxu1 %vm304_vm10, %v5106_v53  ;;  %v4017_v48 = vpop.permute.xlu1 %4016 }
 0x44b   :  { %3798 = vmatpush1.msra.mxu1 %v3784_v58  ;;  %3861 = vmatprep.mubr.f32.mxu1 %v5942_v27  ;;  %v4028_v63 = vsel %vm1741_vm1, %v4017_v48, %v4019_v41 }
 0x44c   :  { %3868 = vmatprep.subr.mxu1 %v3787_v59  ;;  %v4267_v9 = vpop.permute.xlu0 %4266 }
 0x44d   :  { %v4274_v17 = vsel %vm1986_vm3, %v4265_v3, %v4267_v9 }
 0x44e   :  { %5111 = vmatmul.mubr.msk.f32.vlgmr.msra.gmra.mrb[0].mxu1 %vm304_vm10, %v5110_v50  ;;  %v4025_v61 = vpop.permute.xlu1 %4024 }
 0x44f   :  { %3869 = vmatpush1.msra.mxu1 %v3786_v60  ;;  %3932 = vmatprep.mubr.f32.mxu1 %v5942_v27  ;;  %v4031_v5 = vsel %vm1741_vm1, %v4023_v2, %v4025_v61  ;;  %v4032_v10 = vsel %vm1741_vm1, %v4025_v61, %v4027_v62  ;;  %v4772_v62 = vld [vmem:[%s6346_s6] sm:$0xff]  ;;  %s5485_s6 = smov 60  }
 0x450   :  { %5248 = vmatprep.subr.mxu1 %v5942_v27  ;;  %v4271_v13 = vpop.permute.xlu0 %4270 }
 0x452   :  { %5112 = vmatmul.mubr.msk.f32.vlgmr.msra.gmra.mrb[2].mxu1 %vm304_vm10, %v5110_v50  ;;  %v4263_v0 = vpop.permute.xlu1 %4262 }
 0x453   :  { %5249 = vmatpush3.msra.mxu1 %v3788_v51  ;;  %5250 = vmatprep.mubr.msk.f32.mxu1 %vm5483_vm11, %v5942_v27  ;;  %v4273_v11 = vsel %vm1986_vm3, %v4263_v0, %v4265_v3 }
 0x454   :  { %4041 = vmatprep.subr.mxu1 %v4029_v1  ;;  %v4509_v19 = vpop.permute.xlu0 %4508 }
 0x456   :  { %5251 = vmatmul.mubr.msk.f32.vlgmr.msra.gmra.mrb[4].mxu1 %vm304_vm10, %v5110_v50  ;;  %v4261_v4 = vpop.permute.xlu1 %4260 }
 0x457   :  { %4042 = vmatpush1.msra.mxu1 %v4028_v63  ;;  %4105 = vmatprep.mubr.f32.mxu1 %v5942_v27  ;;  %v4272_v14 = vsel %vm1986_vm3, %v4261_v4, %v4263_v0  ;;  %v4776_v0 = vld [vmem:[%s6347_s7] sm:$0xff]  ;;  %s5486_s7 = smov 112  }
 0x458   :  { %4112 = vmatprep.subr.mxu1 %v4031_v5  ;;  %v4511_v23 = vpop.permute.xlu0 %4510 }
 0x459   :  { %v4518_v28 = vsel %vm2231_vm4, %v4509_v19, %v4511_v23 }
 0x45a   :  { %5115 = vmatmul.mubr.msk.f32.vlgmr.msra.gmra.mrb[0].mxu1 %vm304_vm10, %v5114_v6  ;;  %v4269_v8 = vpop.permute.xlu1 %4268 }
 0x45b   :  { %4113 = vmatpush1.msra.mxu1 %v4030_v7  ;;  %4176 = vmatprep.mubr.f32.mxu1 %v5942_v27  ;;  %v4275_v15 = vsel %vm1986_vm3, %v4267_v9, %v4269_v8  ;;  %v4276_v20 = vsel %vm1986_vm3, %v4269_v8, %v4271_v13 }
 0x45c   :  { %5253 = vmatprep.subr.mxu1 %v5942_v27  ;;  %v4515_v29 = vpop.permute.xlu0 %4514 }
 0x45e   :  { %5116 = vmatmul.mubr.msk.f32.vlgmr.msra.gmra.mrb[2].mxu1 %vm304_vm10, %v5114_v6  ;;  %v4507_v12 = vpop.permute.xlu1 %4506 }
 0x45f   :  { %5254 = vmatpush3.msra.mxu1 %v4032_v10  ;;  %5255 = vmatprep.mubr.msk.f32.mxu1 %vm5483_vm11, %v5942_v27  ;;  %v4517_v21 = vsel %vm2231_vm4, %v4507_v12, %v4509_v19  ;;  %v4799_v10 = vld [vmem:[#allocation2 + $0x8] sm:$0xff] }
 0x460   :  { %4285 = vmatprep.subr.mxu1 %v4273_v11  ;;  %v4803_v19 = vld [vmem:[#allocation2 + $0x28] sm:$0xff] }
 0x462   :  { %5256 = vmatmul.mubr.msk.f32.vlgmr.msra.gmra.mrb[4].mxu1 %vm304_vm10, %v5114_v6  ;;  %v4505_v18 = vpop.permute.xlu1 %4504 }
 0x463   :  { %4286 = vmatpush1.msra.mxu1 %v4272_v14  ;;  %4349 = vmatprep.mubr.f32.mxu1 %v5942_v27  ;;  %v4516_v24 = vsel %vm2231_vm4, %v4505_v18, %v4507_v12 }
 0x464   :  { %4356 = vmatprep.subr.mxu1 %v4275_v15  ;;  %v4800_v15 = vld [vmem:[#allocation2 + $0x10] sm:$0xff] }
 0x466   :  { %5119 = vmatmul.mubr.msk.f32.vlgmr.msra.gmra.mrb[0].mxu1 %vm304_vm10, %v5118_v16  ;;  %v4513_v22 = vpop.permute.xlu1 %4512 }
 0x467   :  { %4357 = vmatpush1.msra.mxu1 %v4274_v17  ;;  %4420 = vmatprep.mubr.f32.mxu1 %v5942_v27  ;;  %v4519_v25 = vsel %vm2231_vm4, %v4511_v23, %v4513_v22  ;;  %v4520_v30 = vsel %vm2231_vm4, %v4513_v22, %v4515_v29  ;;  %v4802_v17 = vld [vmem:[#allocation2 + $0x20] sm:$0xff] }
 0x468   :  { %5258 = vmatprep.subr.mxu1 %v5942_v27 }
 0x46a   :  { %5120 = vmatmul.mubr.msk.f32.vlgmr.msra.gmra.mrb[2].mxu1 %vm304_vm10, %v5118_v16 }
 0x46b   :  { %5259 = vmatpush3.msra.mxu1 %v4276_v20  ;;  %5260 = vmatprep.mubr.msk.f32.mxu1 %vm5483_vm11, %v5942_v27 }
 0x46c   :  { %4529 = vmatprep.subr.mxu1 %v4517_v21 }
 0x46e   :  { %5261 = vmatmul.mubr.msk.f32.vlgmr.msra.gmra.mrb[4].mxu1 %vm304_vm10, %v5118_v16  ;;  %v4801_v16 = vld [vmem:[#allocation2 + $0x18] sm:$0xff] }
 0x46f   :  { %4530 = vmatpush1.msra.mxu1 %v4516_v24  ;;  %4593 = vmatprep.mubr.f32.mxu1 %v5942_v27 }
 0x470   :  { %4600 = vmatprep.subr.mxu1 %v4519_v25 }
 0x472   :  { %5123 = vmatmul.mubr.msk.f32.vlgmr.msra.gmra.mrb[0].mxu1 %vm304_vm10, %v5122_v26 }
 0x473   :  { %4601 = vmatpush1.msra.mxu1 %v4518_v28  ;;  %4664 = vmatprep.mubr.f32.mxu1 %v5942_v27 }
 0x474   :  { %5263 = vmatprep.subr.mxu1 %v5942_v27 }
 0x476   :  { %5124 = vmatmul.mubr.msk.f32.vlgmr.msra.gmra.mrb[2].mxu1 %vm304_vm10, %v5122_v26 }
 0x477   :  { %5264 = vmatpush3.msra.mxu1 %v4520_v30  ;;  %5265 = vmatprep.mubr.msk.f32.mxu1 %vm5483_vm11, %v5942_v27  ;;  %vm4871_vm11 = vcmask 1044352  }
 0x47a   :  { %5266 = vmatmul.mubr.msk.f32.vlgmr.msra.gmra.mrb[4].mxu1 %vm304_vm10, %v5122_v26  ;;  %vm4868_vm10 = vcmask 932864  }
 0x545   :  { %v4595_v31 = vpop.f32.mrb[0].mxu1 }
 0x546   :  { %v4746_v32 = vmul.f32 %v4595_v31, %v5921_v45  ;;  %v4597_v33 = vpop.f32.mrb[1].mxu1 }
 0x547   :  { %v4747_v34 = vmul.f32 %v4597_v33, %v5923_v47 }
 0x548   :  { %v4757_v35 = vmul.f32 %v4746_v32, %v4595_v31 }
 0x549   :  { %v4751_v36 = vadd.f32 %v4747_v34, %v4746_v32  ;;  %v4758_v37 = vmul.f32 %v4747_v34, %v4597_v33  ;;  %v4666_v38 = vpop.f32.mrb[2].mxu1 }
 0x54a   :  { %v4748_v39 = vmul.f32 %v4666_v38, %v5926_v52  ;;  %v4668_v40 = vpop.f32.mrb[3].mxu1 }
 0x54b   :  { %v4762_v43 = vadd.f32 %v4758_v37, %v4757_v35  ;;  %v4749_v44 = vmul.f32 %v4668_v40, %v5929_v56 }
 0x54c   :  { %v4752_v46 = vadd.f32 %v4751_v36, %v4748_v39  ;;  %v4759_v27 = vmul.f32 %v4748_v39, %v4666_v38 }
 0x54d   :  { %v4760_v49 = vmul.f32 %v4749_v44, %v4668_v40  ;;  %v4737_v53 = vpop.f32.mrb[4].mxu1 }
 0x54e   :  { %v4763_v55 = vadd.f32 %v4762_v43, %v4759_v27  ;;  %v4753_v42 = vadd.f32 %v4752_v46, %v4749_v44  ;;  %v4750_v45 = vmul.f32 %v4737_v53, %v5932_v54  ;;  %v5267_v41 = vpop.f32.mrb[5].mxu1 }
 0x550   :  { %v4764_v47 = vadd.f32 %v4763_v55, %v4760_v49  ;;  %v4761_v57 = vmul.f32 %v4750_v45, %v4737_v53  ;;  %v4754_v2 = vadd.f32 %v4753_v42, %v4750_v45 }
 0x552   :  { %4755 = vadd.xlane.f32.xlu1 %v4754_v2  ;;  %v4765_v58 = vadd.f32 %v4764_v47, %v4761_v57 }
 0x554   :  { %4766 = vadd.xlane.f32.xlu0 %v4765_v58 }
 0x5df   :  { %v4756_v52 = vpop.xlane.xlu1 %4755 }
 0x5e0   :  { %v4768_v48 = vmul.f32 0.001953125, %v4756_v52 }
 0x5e1   :  { %v4767_v59 = vpop.xlane.xlu0 %4766 }
 0x5e2   :  { %v4770_v50 = vmul.f32 %v4768_v48, %v4768_v48  ;;  %v4769_v56 = vmul.f32 0.001953125, %v4767_v59 }
 0x5e4   :  { %v4771_v60 = vsub.f32 %v4769_v56, %v4770_v50 }
 0x5e6   :  { %v4773_v61 = vadd.f32 1e-05, %v4771_v60 }
 0x5e8   :  { %5441 = vrsqrt.f32 %v4773_v61 }
 0x5f2   :  { %v5442_v54 = vpop.eup %5441 }
 0x5f3   :  { %v4775_v51 = vmul.f32 %v5442_v54, %v4772_v62 }
 0x5f5   :  { %4781 = vperm.xlu0 %5433, %v4775_v51   ;;  %v4777_v1 = vmul.f32 %v4775_v51, %v4768_v48 }
 0x5f7   :  { %v4778_v3 = vsub.f32 %v4776_v0, %v4777_v1 }
 0x5f9   :  { %4791 = vperm.xlu1 %5434, %v4778_v3  }
 0x674   :  { %v4782_v63 = vpop.permute.xlu0 %4781 }
 0x675   :  { %v4784_v4 = vmul.f32 %v4782_v63, %v4595_v31  ;;  %v4785_v5 = vmul.f32 %v4782_v63, %v4597_v33  ;;  %v4786_v6 = vmul.f32 %v4782_v63, %v4666_v38  ;;  %v4787_v7 = vmul.f32 %v4782_v63, %v4668_v40 }
 0x676   :  { %v4788_v8 = vmul.f32 %v4782_v63, %v4737_v53 }
 0x678   :  { %v4792_v9 = vpop.permute.xlu1 %4791 }
 0x679   :  { %v4794_v11 = vadd.f32 %v4792_v9, %v4784_v4  ;;  %v4795_v12 = vadd.f32 %v4792_v9, %v4785_v5  ;;  %v4796_v13 = vadd.f32 %v4792_v9, %v4786_v6  ;;  %v4797_v14 = vadd.f32 %v4792_v9, %v4787_v7 }
 0x67a   :  { %v4798_v18 = vadd.f32 %v4792_v9, %v4788_v8 }
 0x67b   :  { %v4804_v20 = vadd.f32 %v4799_v10, %v4794_v11  ;;  %v4805_v21 = vadd.f32 %v4800_v15, %v4795_v12  ;;  %v4806_v22 = vadd.f32 %v4801_v16, %v4796_v13  ;;  %v4807_v23 = vadd.f32 %v4802_v17, %v4797_v14 }
 0x67c   :  { %v4808_v24 = vadd.f32 %v4803_v19, %v4798_v18 }
 0x67d   :  { %v4809_v25 = vmax.f32 %v4804_v20, 0.0  ;;  %v4810_v26 = vmax.f32 %v4805_v21, 0.0  ;;  %v4811_v28 = vmax.f32 %v4806_v22, 0.0  ;;  %v4812_v29 = vmax.f32 %v4807_v23, 0.0 }
 0x67e   :  { %v4813_v30 = vmax.f32 %v4808_v24, 0.0 }
 0x67f   :  { %4814 = vst [vmem:[#allocation3 + $0x8] sm:$0xff] %v4809_v25  ;;  %4815 = vst [vmem:[#allocation3 + $0x10] sm:$0xff] %v4810_v26 }
 0x680   :  { %4816 = vst [vmem:[#allocation3 + $0x18] sm:$0xff] %v4811_v28  ;;  %4817 = vst [vmem:[#allocation3 + $0x20] sm:$0xff] %v4812_v29 }
 0x681   :  { %4818 = vst [vmem:[#allocation3 + $0x28] sm:$0xff] %v4813_v30 }
 0x686   :  { %v4873_v32 = vld [vmem:[#allocation3 + $0x10] sm:$0xf]  ;;  %v4821_v34 = vld [vmem:[#allocation3 + $0x8] sm:$0xf] }
 0x687   :  { %v4927_v31 = vld [vmem:[#allocation3 + $0x18] sm:$0xf]  ;;  %4875 = vrot.lane.b32.xlu0 %v4873_v32, %s5486_s7  ;;  %v4982_v33 = vld [vmem:[#allocation3 + $0x20] sm:$0xf]  ;;  %v4879_v35 = vld [vmem:[#allocation3 + $0x10] sm:$0xf] }
 0x688   :  { %4929 = vrot.lane.b32.xlu1 %v4927_v31, %s5485_s6  ;;  %v4934_v36 = vld [vmem:[#allocation3 + $0x18] sm:$0xf]  ;;  %v4988_v37 = vld [vmem:[#allocation3 + $0x20] sm:$0xf]  ;;  %v4827_v38 = vld [vmem:[#allocation3 + $0x8] sm:$0xf] }
 0x689   :  { %v4819_v39 = vld [vmem:[#allocation3 + $0x8] sm:$0xf]  ;;  %v4885_v40 = vld [vmem:[#allocation3 + $0x10] sm:$0xf]  ;;  %v4940_v43 = vld [vmem:[#allocation3 + $0x18] sm:$0xf] }
 0x68a   :  { %4820 = vst.msk [vmem:[%s6348_s8] sm:$0xf] %vm38_vm0, %v4819_v39  ;;  %v4834_v44 = vld [vmem:[#allocation3 + $0x8] sm:$0xf]  ;;  %v4891_v46 = vld [vmem:[#allocation3 + $0x10] sm:$0xf] }
 0x68b   :  { %4823 = vrot.lane.b32.xlu0 %v4821_v34, %s5488_s9  ;;  %v4840_v27 = vld [vmem:[#allocation3 + $0x8] sm:$0xf]  ;;  %v4897_v53 = vld [vmem:[#allocation3 + $0x10] sm:$0xf]  ;;  %v4958_v55 = vld [vmem:[#allocation3 + $0x20] sm:$0xf] }
 0x68c   :  { %4984 = vrot.lane.b32.xlu1 %v4982_v33, %s5487_s30  ;;  %v5006_v49 = vld [vmem:[#allocation3 + $0x28] sm:$0xf]  ;;  %v4903_v41 = vld [vmem:[#allocation3 + $0x10] sm:$0xf]  ;;  %v4964_v47 = vld [vmem:[#allocation3 + $0x20] sm:$0xf] }
 0x68d   :  { %v5012_v42 = vld [vmem:[#allocation3 + $0x28] sm:$0xf]  ;;  %v4970_v58 = vld [vmem:[#allocation3 + $0x20] sm:$0xf]  ;;  %v4921_v59 = vld [vmem:[#allocation3 + $0x18] sm:$0xf] }
 0x68e   :  { %v4846_v45 = vld [vmem:[#allocation3 + $0x8] sm:$0xf]  ;;  %v5435_v48 = vld [vmem:[#allocation3 + $0x18] ss:$8 sps:$4 sm:$0xff]   ;;  %s5511_s6 = smov 100   ;;  %s5512_s7 = smov 46  }
 0x68f   :  { %4936 = vrot.lane.b32.xlu0 %v4934_v36, %s5489_s10  ;;  %v5018_v57 = vld [vmem:[#allocation3 + $0x28] sm:$0xf]  ;;  %v5438_v60 = vld [vmem:[#allocation3 + $0x10] ss:$8 sps:$4 sm:$0xff]   ;;  %v4976_v61 = vld [vmem:[#allocation3 + $0x20] sm:$0xf] }
 0x690   :  { %4881 = vrot.lane.b32.xlu1 %v4879_v35, %s5481_s21  ;;  %s5494_s21 = smov 122   ;;  %v4853_v2 = vld [vmem:[#allocation3 + $0x8] sm:$0xf] }
 0x691   :  { %v5024_v52 = vld [vmem:[#allocation3 + $0x28] sm:$0xf] }
 0x692   :  { %v5436_v50 = vld [vmem:[#allocation3 + $0x20] ss:$8 sps:$4 sm:$0xff]  }
 0x693   :  { %4829 = vrot.lane.b32.xlu0 %v4827_v38, %s5491_s4  ;;  %v5437_v56 = vld [vmem:[#allocation3 + $0x8] ss:$8 sps:$4 sm:$0xff]  }
 0x694   :  { %4990 = vrot.lane.b32.xlu1 %v4988_v37, %s5490_s3  ;;  %v5030_v62 = vld [vmem:[#allocation3 + $0x28] sm:$0xf] }
 0x697   :  { %4942 = vrot.lane.b32.xlu0 %v4940_v43, %s5493_s18 }
 0x698   :  { %4887 = vrot.lane.b32.xlu1 %v4885_v40, %s5492_s17 }
 0x69b   :  { %4893 = vrot.lane.b32.xlu0 %v4891_v46, %s5495_s19 }
 0x69c   :  { %4836 = vrot.lane.b32.xlu1 %v4834_v44, %s5494_s21 }
 0x69f   :  { %5008 = vrot.lane.b32.xlu0 %v5006_v49, %s5497_s23 }
 0x6a0   :  { %4842 = vrot.lane.b32.xlu1 %v4840_v27, %s5496_s20 }
 0x6a3   :  { %4960 = vrot.lane.b32.xlu0 %v4958_v55, %s5499_s12 }
 0x6a4   :  { %4899 = vrot.lane.b32.xlu1 %v4897_v53, %s5498_s11 }
 0x6a7   :  { %4848 = vrot.lane.b32.xlu0 %v4846_v45, %s5501_s14 }
 0x6a8   :  { %5014 = vrot.lane.b32.xlu1 %v5012_v42, %s5500_s13 }
 0x6ab   :  { %4966 = vrot.lane.b32.xlu0 %v4964_v47, %s5503_s25 }
 0x6ac   :  { %4905 = vrot.lane.b32.xlu1 %v4903_v41, %s5502_s24 }
 0x6af   :  { %4855 = vrot.lane.b32.xlu0 %v4853_v2, %s5505_s27 }
 0x6b0   :  { %5020 = vrot.lane.b32.xlu1 %v5018_v57, %s5504_s26 }
 0x6b3   :  { %5026 = vrot.lane.b32.xlu0 %v5024_v52, %s5507_s5 }
 0x6b4   :  { %4972 = vrot.lane.b32.xlu1 %v4970_v58, %s5506_s28 }
 0x6b7   :  { %4951 = vrot.lane.b32.xlu0 %v5435_v48, %s5508_s2 }
 0x6b8   :  { %4923 = vrot.lane.b32.xlu1 %v4921_v59, %s5475_s15 }
 0x6bb   :  { %4865 = vrot.lane.b32.xlu0 %v5437_v56, %s5510_s1 }
 0x6bc   :  { %4999 = vrot.lane.b32.xlu1 %v5436_v50, %s5509_s29 }
 0x6bf   :  { %4978 = vrot.lane.b32.xlu0 %v4976_v61, %s5512_s7 }
 0x6c0   :  { %4914 = vrot.lane.b32.xlu1 %v5438_v60, %s5511_s6 }
 0x6c4   :  { %5032 = vrot.lane.b32.xlu1 %v5030_v62, %s5461_s16 }
 0x6f9   :  { %v4876_v51 = vpop.permute.xlu0 %4875 }
 0x6fa   :  { %v4930_v54 = vpop.permute.xlu1 %4929  ;;  %4878 = vst.msk [vmem:[%s6348_s8 + $0x4] sm:$0xf] %vm38_vm0, %v4876_v51 }
 0x6fb   :  { %5126 = vst.msk [vmem:[%s6348_s8 + $0x8] sm:$0xf] %vm38_vm0, %v4930_v54 }
 0x6fd   :  { %v4824_v1 = vpop.permute.xlu0 %4823 }
 0x6fe   :  { %v4985_v0 = vpop.permute.xlu1 %4984  ;;  %4826 = vst.msk [vmem:[%s6348_s8] sm:$0xf] %vm96_vm2, %v4824_v1 }
 0x6ff   :  { %5134 = vst.msk [vmem:[%s6348_s8 + $0xc] sm:$0xf] %vm38_vm0, %v4985_v0  ;;  %vm4851_vm0 = vcmask 781952  }
 0x701   :  { %v4937_v63 = vpop.permute.xlu0 %4936 }
 0x702   :  { %v4882_v3 = vpop.permute.xlu1 %4881  ;;  %5127 = vst.msk [vmem:[%s6348_s8 + $0x8] sm:$0xf] %vm96_vm2, %v4937_v63 }
 0x703   :  { %4884 = vst.msk [vmem:[%s6348_s8 + $0x4] sm:$0xf] %vm96_vm2, %v4882_v3 }
 0x705   :  { %v4830_v5 = vpop.permute.xlu0 %4829 }
 0x706   :  { %v4991_v4 = vpop.permute.xlu1 %4990  ;;  %4833 = vst.msk [vmem:[%s6348_s8] sm:$0xf] %vm4832_vm5, %v4830_v5 }
 0x707   :  { %5135 = vst.msk [vmem:[%s6348_s8 + $0xc] sm:$0xf] %vm96_vm2, %v4991_v4  ;;  %vm4858_vm2 = vcmask 913152  }
 0x709   :  { %v4943_v7 = vpop.permute.xlu0 %4942 }
 0x70a   :  { %v4888_v6 = vpop.permute.xlu1 %4887  ;;  %5128 = vst.msk [vmem:[%s6348_s8 + $0x8] sm:$0xf] %vm4832_vm5, %v4943_v7 }
 0x70b   :  { %4890 = vst.msk [vmem:[%s6348_s8 + $0x4] sm:$0xf] %vm4832_vm5, %v4888_v6 }
 0x70d   :  { %v4894_v9 = vpop.permute.xlu0 %4893 }
 0x70e   :  { %v4837_v8 = vpop.permute.xlu1 %4836  ;;  %4896 = vst.msk [vmem:[%s6348_s8 + $0x4] sm:$0xf] %vm199_vm8, %v4894_v9 }
 0x70f   :  { %4839 = vst.msk [vmem:[%s6348_s8] sm:$0xf] %vm199_vm8, %v4837_v8 }
 0x711   :  { %v5009_v11 = vpop.permute.xlu0 %5008 }
 0x712   :  { %v4843_v10 = vpop.permute.xlu1 %4842 }
 0x713   :  { %4845 = vst.msk [vmem:[%s6348_s8] sm:$0xf] %vm257_vm6, %v4843_v10 }
 0x715   :  { %v4961_v13 = vpop.permute.xlu0 %4960 }
 0x716   :  { %v4900_v12 = vpop.permute.xlu1 %4899 }
 0x717   :  { %4902 = vst.msk [vmem:[%s6348_s8 + $0x4] sm:$0xf] %vm257_vm6, %v4900_v12 }
 0x719   :  { %v4849_v15 = vpop.permute.xlu0 %4848 }
 0x71a   :  { %v5015_v14 = vpop.permute.xlu1 %5014  ;;  %4852 = vst.msk [vmem:[%s6348_s8] sm:$0xf] %vm4851_vm0, %v4849_v15 }
 0x71d   :  { %v4967_v17 = vpop.permute.xlu0 %4966 }
 0x71e   :  { %v4906_v16 = vpop.permute.xlu1 %4905 }
 0x71f   :  { %4908 = vst.msk [vmem:[%s6348_s8 + $0x4] sm:$0xf] %vm4851_vm0, %v4906_v16 }
 0x721   :  { %v4856_v19 = vpop.permute.xlu0 %4855 }
 0x722   :  { %v5021_v18 = vpop.permute.xlu1 %5020  ;;  %4859 = vst.msk [vmem:[%s6348_s8] sm:$0xf] %vm4858_vm2, %v4856_v19 }
 0x725   :  { %v5027_v21 = vpop.permute.xlu0 %5026 }
 0x726   :  { %v4973_v20 = vpop.permute.xlu1 %4972 }
 0x729   :  { %v4952_v23 = vpop.permute.xlu0 %4951 }
 0x72a   :  { %v4924_v22 = vpop.permute.xlu1 %4923  ;;  %v4953_v24 = vrot.slane %v4952_v23, 4 }
 0x72c   :  { %v4955_v25 = vsel %vm4954_vm7, %v4952_v23, %v4953_v24 }
 0x72d   :  { %5129 = vst.msk [vmem:[%s6348_s8 + $0x8] sm:$0xf] %vm199_vm8, %v4955_v25  ;;  %v4866_v28 = vpop.permute.xlu0 %4865 }
 0x72e   :  { %v5000_v26 = vpop.permute.xlu1 %4999  ;;  %5130 = vst.msk [vmem:[%s6348_s8 + $0x8] sm:$0xf] %vm257_vm6, %v4961_v13  ;;  %v4867_v30 = vrot.slane %v4866_v28, 4 }
 0x72f   :  { %v5001_v29 = vrot.slane %v5000_v26, 4  ;;  %5131 = vst.msk [vmem:[%s6348_s8 + $0x8] sm:$0xf] %vm4851_vm0, %v4967_v17 }
 0x730   :  { %5132 = vst.msk [vmem:[%s6348_s8 + $0x8] sm:$0xf] %vm4858_vm2, %v4973_v20  ;;  %v4869_v32 = vsel %vm4868_vm10, %v4866_v28, %v4867_v30 }
 0x731   :  { %v5003_v31 = vsel %vm5002_vm9, %v5000_v26, %v5001_v29  ;;  %4872 = vst.msk [vmem:[%s6348_s8] sm:$0xf] %vm4871_vm11, %v4869_v32  ;;  %v4979_v34 = vpop.permute.xlu0 %4978 }
 0x732   :  { %5136 = vst.msk [vmem:[%s6348_s8 + $0xc] sm:$0xf] %vm4832_vm5, %v5003_v31  ;;  %v4915_v33 = vpop.permute.xlu1 %4914 }
 0x733   :  { %5137 = vst.msk [vmem:[%s6348_s8 + $0xc] sm:$0xf] %vm199_vm8, %v5009_v11  ;;  %v4916_v35 = vrot.slane %v4915_v33, 4 }
 0x734   :  { %5133 = vst.msk [vmem:[%s6348_s8 + $0x8] sm:$0xf] %vm4871_vm11, %v4979_v34 }
 0x735   :  { %5138 = vst.msk [vmem:[%s6348_s8 + $0xc] sm:$0xf] %vm257_vm6, %v5015_v14  ;;  %v4918_v36 = vsel %vm4917_vm12, %v4915_v33, %v4916_v35 }
 0x736   :  { %5139 = vst.msk [vmem:[%s6348_s8 + $0xc] sm:$0xf] %vm4851_vm0, %v5021_v18  ;;  %v5033_v37 = vpop.permute.xlu1 %5032 }
 0x737   :  { %5140 = vst.msk [vmem:[%s6348_s8 + $0xc] sm:$0xf] %vm4858_vm2, %v5027_v21  ;;  %4920 = vst.msk [vmem:[%s6348_s8 + $0x4] sm:$0xf] %vm4858_vm2, %v4918_v36 }
 0x738   :  { %4926 = vst.msk [vmem:[%s6348_s8 + $0x4] sm:$0xf] %vm4871_vm11, %v4924_v22  ;;  %5141 = vst.msk [vmem:[%s6348_s8 + $0xc] sm:$0xf] %vm4871_vm11, %v5033_v37 }

</bundles_post_ra>
